<compile_context>
chip_gen: v6e
topology: v6e:2x2x1
jax: 0.10.0
libtpu: 0.0.40
codegen_flags: <defaults>
</compile_context>

<pallas_src>
import jax
import jax.numpy as jnp
from jax.experimental import pallas as pl
from jax.experimental.pallas import tpu as pltpu


def ffn_kernel(x_ref, mas_ref, w1_ref, b1_ref, w2_ref, b2_ref, o_ref, acc_ref):
    # x_ref:   (tm, d_model) bf16      mas_ref: (tm, 1) f32
    # w1_ref:  (d_model, th) bf16      b1_ref:  (1, th) f32
    # w2_ref:  (th, d_model) bf16      b2_ref:  (1, d_model) f32
    # o_ref:   (tm, d_model) out dtype acc_ref: (tm, d_model) f32 scratch
    k = pl.program_id(1)

    @pl.when(k == 0)
    def _():
        acc_ref[...] = jnp.zeros_like(acc_ref)

    # First Linear on the active hidden slice: bf16 operands, f32 accumulate.
    h = jnp.dot(x_ref[...], w1_ref[...], preferred_element_type=jnp.float32)
    h = jnp.maximum(h + b1_ref[...], 0.0)  # bias + ReLU for this hidden chunk
    # dropout with p=0.0 is the identity -> omitted

    # Second Linear partial sum over this hidden chunk (cast h back to bf16
    # for MXU throughput, accumulate in f32 scratch).
    acc_ref[...] += jnp.dot(
        h.astype(w2_ref.dtype), w2_ref[...], preferred_element_type=jnp.float32
    )

    @pl.when(k == pl.num_programs(1) - 1)
    def _():
        y = acc_ref[...] + b2_ref[...]
        y = y * mas_ref[...]  # broadcast (tm, 1) over the feature axis
        o_ref[...] = y.astype(o_ref.dtype)


def ffn_pallas(x, mas, w1_t, b1, w2_t, b2, *, tm=256, th=512,
               compute_dtype=jnp.bfloat16, vmem_limit_bytes=64 * 1024 * 1024):
    """x: (B, S, d_model), mas: (B, S, 1). Returns (B, S, d_model).

    w1_t: (d_model, d_hid), w2_t: (d_hid, d_model)  (pre-transposed Linear weights).
    """
    B, S, d_model = x.shape
    d_hid = w1_t.shape[1]
    N = B * S

    # Lane-dense layout requirements (multiples of 128 on the feature axes).
    assert d_model % 128 == 0, "d_model must be a multiple of 128"
    assert d_hid % 128 == 0, "d_hid must be a multiple of 128"

    # Clamp tiles to the problem size while keeping (8,128) tiling legal.
    tm = min(tm, N)
    assert N % tm == 0 and (tm % 8 == 0 or tm == N), "bad token tile"
    th = min(th, d_hid)
    assert d_hid % th == 0 and th % 128 == 0, "bad hidden tile"

    x2 = x.reshape(N, d_model).astype(compute_dtype)
    m2 = mas.reshape(N, 1).astype(jnp.float32)
    w1c = w1_t.astype(compute_dtype)
    w2c = w2_t.astype(compute_dtype)
    b1_2 = b1.reshape(1, d_hid).astype(jnp.float32)
    b2_2 = b2.reshape(1, d_model).astype(jnp.float32)

    grid = (N // tm, d_hid // th)

    out = pl.pallas_call(
        ffn_kernel,
        out_shape=jax.ShapeDtypeStruct((N, d_model), x.dtype),
        grid_spec=pltpu.PrefetchScalarGridSpec(
            num_scalar_prefetch=0,
            grid=grid,
            in_specs=[
                pl.BlockSpec((tm, d_model), lambda i, k: (i, 0)),   # x tile
                pl.BlockSpec((tm, 1), lambda i, k: (i, 0)),         # mask tile
                pl.BlockSpec((d_model, th), lambda i, k: (0, k)),   # W1 chunk
                pl.BlockSpec((1, th), lambda i, k: (0, k)),         # b1 chunk
                pl.BlockSpec((th, d_model), lambda i, k: (k, 0)),   # W2 chunk
                pl.BlockSpec((1, d_model), lambda i, k: (0, 0)),    # b2
            ],
            out_specs=pl.BlockSpec((tm, d_model), lambda i, k: (i, 0)),
            scratch_shapes=[pltpu.VMEM((tm, d_model), jnp.float32)],
        ),
        compiler_params=pltpu.CompilerParams(
            dimension_semantics=("parallel", "arbitrary"),
            vmem_limit_bytes=vmem_limit_bytes,
        ),
    )(x2, m2, w1c, b1_2, w2c, b2_2)
    return out.reshape(B, S, d_model)


def init_ffn_params(key, d_model, d_hid):
    """Deterministic init matching nn.Linear default (U(-1/sqrt(in), 1/sqrt(in)))."""
    k1, k2, k3, k4 = jax.random.split(key, 4)
    bound1 = 1.0 / (d_model ** 0.5)
    bound2 = 1.0 / (d_hid ** 0.5)
    # PyTorch stores Linear weight as (out, in); we keep it transposed (in, out).
    w1_t = jax.random.uniform(k1, (d_model, d_hid), jnp.float32, -bound1, bound1)
    b1 = jax.random.uniform(k2, (d_hid,), jnp.float32, -bound1, bound1)
    w2_t = jax.random.uniform(k3, (d_hid, d_model), jnp.float32, -bound2, bound2)
    b2 = jax.random.uniform(k4, (d_model,), jnp.float32, -bound2, bound2)
    return w1_t, b1, w2_t, b2


if __name__ == "__main__":
    # Module defaults d_model=d_hid=512 (multiples of 128 -> lane-dense), a
    # modest token count, and th=256 so the hidden-dim reduction axis actually
    # runs >1 step and exercises the accumulate/finalize path.
    B, S, d_model, d_hid = 2, 64, 512, 512
    key = jax.random.PRNGKey(0)
    kx, km, kp = jax.random.split(key, 3)

    x = jax.random.normal(kx, (B, S, d_model), jnp.float32)
    # padding-style mask (B, S, 1) of 0/1 floats
    mas = (jax.random.uniform(km, (B, S, 1)) > 0.25).astype(jnp.float32)
    w1_t, b1, w2_t, b2 = init_ffn_params(kp, d_model, d_hid)

    out = ffn_pallas(x, mas, w1_t, b1, w2_t, b2, tm=256, th=256)
    out = jax.block_until_ready(out)

    # Reference in plain JAX (f32). Kernel uses bf16 operands with f32
    # accumulation, so tolerance is loosened accordingly.
    h_ref = jnp.maximum(x @ w1_t + b1, 0.0)
    y_ref = (h_ref @ w2_t + b2) * mas
    assert out.shape == y_ref.shape
    assert jnp.allclose(out, y_ref, atol=5e-2, rtol=5e-2), (
        float(jnp.max(jnp.abs(out - y_ref)))
    )

    print("KERNEL_OK")
</pallas_src>

<mosaic_0001>
module attributes {stable_mosaic.version = 11 : i64} {
  func.func @ffn_kernel(%arg0: i32, %arg1: i32, %arg2: memref<128x512xbf16, #tpu.memory_space<vmem>>, %arg3: memref<128x1xf32, #tpu.memory_space<vmem>>, %arg4: memref<512x256xbf16, #tpu.memory_space<vmem>>, %arg5: memref<1x256xf32, #tpu.memory_space<vmem>>, %arg6: memref<256x512xbf16, #tpu.memory_space<vmem>>, %arg7: memref<1x512xf32, #tpu.memory_space<vmem>>, %arg8: memref<128x512xf32, #tpu.memory_space<vmem>>, %arg9: memref<128x512xf32, #tpu.memory_space<vmem>>) attributes {dimension_semantics = [#tpu.dimension_semantics<parallel>, #tpu.dimension_semantics<arbitrary>], iteration_bounds = array<i64: 1, 2>, scalar_prefetch = 0 : i64, scratch_operands = 1 : i64, tpu.core_type = #tpu.core_type<tc>, window_params = [{transform_indices = @transform_0, window_bounds = array<i64: 128, 512>}, {transform_indices = @transform_1, window_bounds = array<i64: 128, 1>}, {transform_indices = @transform_2, window_bounds = array<i64: 512, 256>}, {transform_indices = @transform_3, window_bounds = array<i64: 1, 256>}, {transform_indices = @transform_4, window_bounds = array<i64: 256, 512>}, {pipeline_mode = #tpu.pipeline_mode<synchronous>, transform_indices = @transform_5, window_bounds = array<i64: 1, 512>}, {transform_indices = @transform_6, window_bounds = array<i64: 128, 512>}]} {
    %c0_i32 = arith.constant 0 : i32
    %0 = arith.cmpi eq, %arg1, %c0_i32 : i32
    %1 = arith.extui %0 : i1 to i32
    %c0_i32_0 = arith.constant 0 : i32
    %2 = arith.cmpi ne, %1, %c0_i32_0 : i32
    scf.if %2 {
      %cst_15 = arith.constant 0.000000e+00 : f32
      %20 = vector.broadcast %cst_15 : f32 to vector<128x512xf32>
      %c0_16 = arith.constant 0 : index
      %c0_17 = arith.constant 0 : index
      %21 = vector.load %arg9[%c0_16, %c0_17] : memref<128x512xf32, #tpu.memory_space<vmem>>, vector<128x512xf32>
      tpu.vector_store %arg9[%c0_16, %c0_17], %20 {strides = array<i32>} : memref<128x512xf32, #tpu.memory_space<vmem>>, vector<128x512xf32>,
    } else {
    }
    %c0 = arith.constant 0 : index
    %c0_1 = arith.constant 0 : index
    %3 = vector.load %arg2[%c0, %c0_1] : memref<128x512xbf16, #tpu.memory_space<vmem>>, vector<128x512xbf16>
    %c0_2 = arith.constant 0 : index
    %c0_3 = arith.constant 0 : index
    %4 = vector.load %arg4[%c0_2, %c0_3] : memref<512x256xbf16, #tpu.memory_space<vmem>>, vector<512x256xbf16>
    %cst = arith.constant dense<0.000000e+00> : vector<128x256xf32>
    %5 = tpu.matmul %3, %4, %cst {dimension_numbers = #tpu.dot_dimension_numbers<[1], [0], [0], [1], [0, 0, 1, 1], [], []>} : vector<128x512xbf16>, vector<512x256xbf16>, vector<128x256xf32> -> vector<128x256xf32>
    %c0_4 = arith.constant 0 : index
    %c0_5 = arith.constant 0 : index
    %6 = vector.load %arg5[%c0_4, %c0_5] : memref<1x256xf32, #tpu.memory_space<vmem>>, vector<1x256xf32>
    %7 = vector.broadcast %6 : vector<1x256xf32> to vector<128x256xf32>
    %8 = arith.addf %5, %7 : vector<128x256xf32>
    %cst_6 = arith.constant 0.000000e+00 : f32
    %9 = vector.broadcast %cst_6 : f32 to vector<128x256xf32>
    %10 = arith.maximumf %8, %9 : vector<128x256xf32>
    %c0_7 = arith.constant 0 : index
    %c0_8 = arith.constant 0 : index
    %11 = vector.load %arg9[%c0_7, %c0_8] : memref<128x512xf32, #tpu.memory_space<vmem>>, vector<128x512xf32>
    %12 = arith.truncf %10 : vector<128x256xf32> to vector<128x256xbf16>
    %c0_9 = arith.constant 0 : index
    %c0_10 = arith.constant 0 : index
    %13 = vector.load %arg6[%c0_9, %c0_10] : memref<256x512xbf16, #tpu.memory_space<vmem>>, vector<256x512xbf16>
    %cst_11 = arith.constant dense<0.000000e+00> : vector<128x512xf32>
    %14 = tpu.matmul %12, %13, %cst_11 {dimension_numbers = #tpu.dot_dimension_numbers<[1], [0], [0], [1], [0, 0, 1, 1], [], []>} : vector<128x256xbf16>, vector<256x512xbf16>, vector<128x512xf32> -> vector<128x512xf32>
    %15 = arith.addf %11, %14 : vector<128x512xf32>
    %c0_12 = arith.constant 0 : index
    %c0_13 = arith.constant 0 : index
    %16 = vector.load %arg9[%c0_12, %c0_13] : memref<128x512xf32, #tpu.memory_space<vmem>>, vector<128x512xf32>
    tpu.vector_store %arg9[%c0_12, %c0_13], %15 {strides = array<i32>} : memref<128x512xf32, #tpu.memory_space<vmem>>, vector<128x512xf32>,
    %c1_i32 = arith.constant 1 : i32
    %17 = arith.cmpi eq, %arg1, %c1_i32 : i32
    %18 = arith.extui %17 : i1 to i32
    %c0_i32_14 = arith.constant 0 : i32
    %19 = arith.cmpi ne, %18, %c0_i32_14 : i32
    scf.if %19 {
      %c0_15 = arith.constant 0 : index
      %c0_16 = arith.constant 0 : index
      %20 = vector.load %arg9[%c0_15, %c0_16] : memref<128x512xf32, #tpu.memory_space<vmem>>, vector<128x512xf32>
      %c0_17 = arith.constant 0 : index
      %c0_18 = arith.constant 0 : index
      %21 = vector.load %arg7[%c0_17, %c0_18] : memref<1x512xf32, #tpu.memory_space<vmem>>, vector<1x512xf32>
      %22 = vector.broadcast %21 : vector<1x512xf32> to vector<128x512xf32>
      %23 = arith.addf %20, %22 : vector<128x512xf32>
      %c0_19 = arith.constant 0 : index
      %c0_20 = arith.constant 0 : index
      %24 = vector.load %arg3[%c0_19, %c0_20] : memref<128x1xf32, #tpu.memory_space<vmem>>, vector<128x1xf32>
      %25 = vector.broadcast %24 : vector<128x1xf32> to vector<128x512xf32>
      %26 = arith.mulf %23, %25 : vector<128x512xf32>
      %c0_21 = arith.constant 0 : index
      %c0_22 = arith.constant 0 : index
      %27 = vector.load %arg8[%c0_21, %c0_22] : memref<128x512xf32, #tpu.memory_space<vmem>>, vector<128x512xf32>
      tpu.vector_store %arg8[%c0_21, %c0_22], %26 {strides = array<i32>} : memref<128x512xf32, #tpu.memory_space<vmem>>, vector<128x512xf32>,
    } else {
    }
    return
  }
  func.func @transform_0(%arg0: i32, %arg1: i32) -> (i32, i32) {
    %c0_i32 = arith.constant 0 : i32
    %c0_i32_0 = arith.constant 0 : i32
    return %arg0, %c0_i32 : i32, i32
  }
  func.func @transform_1(%arg0: i32, %arg1: i32) -> (i32, i32) {
    %c0_i32 = arith.constant 0 : i32
    %c0_i32_0 = arith.constant 0 : i32
    return %arg0, %c0_i32 : i32, i32
  }
  func.func @transform_2(%arg0: i32, %arg1: i32) -> (i32, i32) {
    %c0_i32 = arith.constant 0 : i32
    %c0_i32_0 = arith.constant 0 : i32
    return %c0_i32, %arg1 : i32, i32
  }
  func.func @transform_3(%arg0: i32, %arg1: i32) -> (i32, i32) {
    %c0_i32 = arith.constant 0 : i32
    %c0_i32_0 = arith.constant 0 : i32
    return %c0_i32, %arg1 : i32, i32
  }
  func.func @transform_4(%arg0: i32, %arg1: i32) -> (i32, i32) {
    %c0_i32 = arith.constant 0 : i32
    %c0_i32_0 = arith.constant 0 : i32
    return %arg1, %c0_i32 : i32, i32
  }
  func.func @transform_5(%arg0: i32, %arg1: i32) -> (i32, i32) {
    %c0_i32 = arith.constant 0 : i32
    %c0_i32_0 = arith.constant 0 : i32
    %c0_i32_1 = arith.constant 0 : i32
    return %c0_i32, %c0_i32_0 : i32, i32
  }
  func.func @transform_6(%arg0: i32, %arg1: i32) -> (i32, i32) {
    %c0_i32 = arith.constant 0 : i32
    %c0_i32_0 = arith.constant 0 : i32
    return %arg0, %c0_i32 : i32, i32
  }
}

</mosaic_0001>

<bundles_post_ra>
// kernel: tpu_custom_call.1
= control target key start
LH: loop header
LB: loop body
LE: loop exit
PB: predicated region body
PF: predicated region fallthrough
CT: control target
= control target key end

     0   :  { %11 = vsyncpa [#allocation4], 0  ;;  %s3900_s0 = inlined_call_operand.hbm [shape: bf16[128,512], index: 0, kind: input, shape index: {}]   ;;  %s3901_s1 = inlined_call_operand.vmem [shape: f32[128,1], index: 1, kind: input, shape index: {}]   ;;  %s3902_s2 = inlined_call_operand.hbm [shape: bf16[512,512], index: 2, kind: input, shape index: {}]   ;;  %s3903_s3 = inlined_call_operand.vmem [shape: f32[1,512], index: 3, kind: input, shape index: {}]   ;;  %s3904_s4 = inlined_call_operand.hbm [shape: bf16[512,512], index: 4, kind: input, shape index: {}]   ;;  %s3905_s5 = inlined_call_operand.vmem [shape: f32[1,512], index: 5, kind: input, shape index: {}]   ;;  %s3906_s6 = inlined_call_operand.hbm [shape: f32[128,512], index: 6, kind: output, shape index: {}]  }
   0x1   :  { %12 = vsyncpa [#allocation7], 0 }
   0x2   :  { %14 = vsyncpa [#allocation7 + $0x1], 0 }
   0x3   :  { %15 = vsyncpa [#allocation5], 0  ;;  %s3351_s21 = smov 0   ;;  %s3353_s22 = smov 0  }
   0x4   :  { %s3355_s23 = smov 0   ;;  %s3357_s24 = smov 0  }
   0x5   :  { %s3359_s25 = smov 0   ;;  %s3361_s26 = smov 0  }
   0x6 LB: > { %s30_s27 = sadd.s32 1, %s3298_s25  ;;  %s92_s28 = sadd.s32 1, %s3290_s23  ;;  %s3302_s26 = sphi %s3361_s26, %s21_s26   ;;  %s3298_s25 = sphi %s3359_s25, %s3915_s25   ;;  %s3294_s24 = sphi %s3357_s24, %s3914_s24   ;;  %s3290_s23 = sphi %s3355_s23, %s3913_s23   ;;  %s3286_s22 = sphi %s3353_s22, %s3912_s22   ;;  %s3282_s21 = sphi %s3351_s21, %s3911_s21  }
   0x7   : > { %p31_p0 = scmp.ge.s32.totalorder %s30_s27, 2  ;;  %p99_p1 = scmp.ne.s32.totalorder %s3290_s23, %s3286_s22 }
   0x8   : > { %p100_p2 = scmp.eq.s32.totalorder %s3302_s26, 0  ;;  %p2834_p4 = scmp.lt.s32.totalorder %s3302_s26, 2 }
   0x9   : > { %s3917_s27 = smov (%p31_p0, %s30_s27), 0  ;;  %s257_s30 = sand.u32 1, %s3302_s26  }
   0xa   : > { %p101_p3 = por %p100_p2, %p99_p1  ;;  %s89_s29 = ssub.s32 %s3298_s25, %s3917_s27 }
   0xb   : > { %p90_p5 = scmp.eq.s32.totalorder %s89_s29, 0  ;;  %s259_s7 = sand.u32 1, %s3290_s23  }
   0xc   : > { %s3396_s9 = sshll.u32 %s259_s7, 9  ;;  %s2807_s10 = sshll.u32 %s3298_s25, 7 }
   0xd   : > { %s3394_s8 = scalar_select %p90_p5, %s3290_s23, %s92_s28  }
   0xe   : > { %s267_s13 = scalar_lea.hbm %s3902_s2, %s2807_s10  ;;  %s261_s14 = scalar_lea.vmem [#allocation6], %s3396_s9 }
   0xf   : > { %s268_s15 = sshll.u32 %s261_s14, 4  ;;  %p3403_p6 = pnand %p2834_p4, %p101_p3  ;;  %s269_s15 = int_to_ptr.vmem [resolvable:$true] %s268_s15 }
  0x10   : > { %s3407_s17 = scalar_lea.sflag [#allocation7], %s257_s30  ;;  %s3151_s18 = scalar_lea.vmem %s269_s15, 8192 }
  0x11   : > { %p3140_p7 = pneg %p3403_p6  ;;  %p3152_p8 = scmp.ne.s32.totalorder %s269_s15, %s3151_s18 }
  0x12   : > { %s3304_s19 = smov [#allocation6]  }
  0x13   : > { %p3154_p9 = pnand %p3152_p8, %p3140_p7  ;;  %s3156_s20 = sshll.u32 %s3304_s19, 4  ;;  %s3157_s20 = int_to_ptr.vmem [resolvable:$false] %s3156_s20 }
  0x14   : > { %s3158_s28 = scalar_lea.vmem %s3157_s20, 16384  ;;  %p3159_p11 = scmp.lt.s32.totalorder %s269_s15, %s3157_s20 }
  0x15   : > { %p3155_p10 = pneg %p3154_p9  ;;  %p3160_p12 = scmp.lt.s32.totalorder %s3158_s28, %s3151_s18 }
  0x17   : > { %p3161_p13 = por %p3160_p12, %p3159_p11 }
  0x19   : > { %p3162_p0 = pnand %p3161_p13, %p3155_p10 }
  0x1b   : > { %3165 = shalt.err (!%p3162_p0)
}
  0x1c   : > { %s3305_s29 = smov 256   ;;  %s3306_s30 = smov 128  }
  0x1d   : > { %s3307_s7 = smov 8   ;;  %s3419_s10 = sadd.s32 4294967295, %s3302_s26  }
  0x1e   : > { %2829 = dma.hbm_to_vmem [thread:$0]  (!%p3403_p6), %s267_s13, 8192, %s269_s15, %s3407_s17, %s3305_s29, %s3306_s30, %s3307_s7  }
  0x1f   : > { %p105_p1 = scmp.ne.s32.totalorder %s3286_s22, %s3282_s21  ;;  %p106_p2 = scmp.eq.s32.totalorder %s3419_s10, 0 }
  0x20   : > { %p2625_p3 = scmp.ge.s32.totalorder %s3302_s26, 1  ;;  %p215_p4 = scmp.lt.s32.totalorder %s3302_s26, 3 }
  0x21   : > { %p3428_p5 = por %p106_p2, %p105_p1  ;;  %s3308_s13 = smov [#allocation3]  }
  0x22   : > { %p3432_p8 = pnand %p2625_p3, %p215_p4  ;;  %s231_s14 = sshll.u32 %s3308_s13, 4  ;;  %s232_s14 = int_to_ptr.vmem [resolvable:$true] %s231_s14 }
  0x23   : > { %s2809_s15 = sshll.u32 %s3298_s25, 13  ;;  %s290_s21 = scalar_lea.vmem [#allocation8], %s3396_s9 }
  0x24   : > { %p2822_p9 = pneg %p3432_p8  ;;  %s298_s18 = sshll.u32 %s290_s21, 4  ;;  %s3451_s18 = int_to_ptr.vmem [resolvable:$true] %s298_s18 }
  0x25   : > { %s3449_s30 = scalar_lea.hbm %s3904_s4, %s2809_s15  ;;  %s3177_s7 = scalar_lea.vmem %s232_s14, 4096 }
  0x26   : > { %p3442_p10 = pnand %p2822_p9, %p106_p2  ;;  %p3178_p12 = scmp.ne.s32.totalorder %s232_s14, %s3177_s7 }
  0x27   : > { %p3185_p1 = scmp.lt.s32.totalorder %s232_s14, %s232_s14  ;;  %p3186_p3 = scmp.lt.s32.totalorder %s3177_s7, %s3177_s7 }
  0x28   : > { %p3168_p11 = pneg %p3442_p10 }
  0x29   : > { %p3187_p4 = por %p3186_p3, %p3185_p1 }
  0x2a   : > { %p3180_p13 = pnand %p3178_p12, %p3168_p11 }
  0x2c   : > { %p3181_p0 = pneg %p3180_p13 }
  0x2e   : > { %p3188_p9 = pnand %p3187_p4, %p3181_p0 }
  0x30   : > { %3191 = shalt.err (!%p3188_p9)
}
  0x31   : > { %s3309_s9 = smov 16   ;;  %s3205_s21 = scalar_lea.vmem %s3451_s18, 8192 }
  0x32   : > { %2825 = dma.hbm_to_vmem [thread:$0]  (!%p3442_p10), %s3900_s0, 4096, %s232_s14, [#allocation4], %s3305_s29, %s3305_s29, %s3309_s9  }
  0x33   : > { %p3206_p11 = scmp.ne.s32.totalorder %s3451_s18, %s3205_s21  ;;  %s3310_s20 = smov [#allocation8]  }
  0x34   : > { %s3210_s28 = sshll.u32 %s3310_s20, 4  ;;  %s3211_s28 = int_to_ptr.vmem [resolvable:$false] %s3210_s28 }
  0x35   : > { %p3208_p12 = pnand %p3206_p11, %p3140_p7  ;;  %s3212_s19 = scalar_lea.vmem %s3211_s28, 16384 }
  0x36   : > { %p3213_p0 = scmp.lt.s32.totalorder %s3451_s18, %s3211_s28  ;;  %p3214_p1 = scmp.lt.s32.totalorder %s3212_s19, %s3205_s21 }
  0x37   : > { %p3209_p13 = pneg %p3208_p12 }
  0x38   : > { %p3215_p3 = por %p3214_p1, %p3213_p0 }
  0x3a   : > { %p3216_p4 = pnand %p3215_p3, %p3209_p13 }
  0x3c   : > { %3219 = shalt.err (!%p3216_p4)
}
  0x3d   : > { %2832 = dma.hbm_to_vmem [thread:$0]  (!%p3403_p6), %s3449_s30, 8192, %s3451_s18, %s3407_s17, %s3305_s29, %s3305_s29, %s3309_s9  }
  0x3e   : > { %310 = sbr.rel (%p3432_p8) target bundleno = 823 (0x337), region = 44 }
  0x43   : > { %3269 = dma.done.wait (%p106_p2), [#allocation4], 4096  }
  0x44   : > { %3271 = vsyncadd (%p106_p2), [#allocation4], 4294963200  ;;  %s316_s14 = sand.u32 1, %s3419_s10   ;;  %s318_s16 = sand.u32 1, %s3286_s22  }
  0x45   : > { %s2638_s7 = sshll.u32 %s318_s16, 9  ;;  %s317_s13 = scalar_lea.sflag [#allocation7], %s316_s14 }
  0x46   : > { %s3483_s15 = scalar_lea.vmem [#allocation6], %s2638_s7 }
  0x47   : > { %3273 = dma.done.wait (%p3428_p5), %s317_s13, 16384  }
  0x48   : > { %3275 = vsyncadd (%p3428_p5), %s317_s13, 4294950912  ;;  %s2640_s17 = sshll.u32 %s3294_s24, 1  ;;  %s3496_s30 = scalar_lea.vmem [#allocation8], %s2638_s7 }
  0x49   : > { %p376_p6 = scmp.lt.s32.totalorder %s2640_s17, 3  ;;  %p2641_p7 = scmp.ne.s32.totalorder %s3294_s24, 0 }
  0x4b   : > { %s3919_s17 = smov (!%p376_p6, %s2640_s17), 3  ;;  %385 = sbr.rel (%p2641_p7) target bundleno = 113 (0x71), region = 60 }
  0x4c   : > { %s378_s18 = scalar_lea.vmem %s3903_s3, %s3919_s17 }
  0x50   : > { %v3311_v0 = vmov 0.0  }
  0x51   : > { %386 = vst [vmem:[#allocation2 + $0xb0] sm:$0xff] %v3311_v0  ;;  %387 = vst [vmem:[#allocation2 + $0x1b0] sm:$0xff] %v3311_v0 }
  0x52   : > { %388 = vst [vmem:[#allocation2 + $0xd8] sm:$0xff] %v3311_v0  ;;  %389 = vst [vmem:[#allocation2 + $0x18] sm:$0xff] %v3311_v0 }
  0x53   : > { %390 = vst [vmem:[#allocation2 + $0x50] sm:$0xff] %v3311_v0  ;;  %391 = vst [vmem:[#allocation2 + $0x168] sm:$0xff] %v3311_v0 }
  0x54   : > { %392 = vst [vmem:[#allocation2 + $0x130] sm:$0xff] %v3311_v0  ;;  %393 = vst [vmem:[#allocation2 + $0x48] sm:$0xff] %v3311_v0 }
  0x55   : > { %394 = vst [vmem:[#allocation2 + $0x180] sm:$0xff] %v3311_v0  ;;  %395 = vst [vmem:[#allocation2 + $0x110] sm:$0xff] %v3311_v0 }
  0x56   : > { %396 = vst [vmem:[#allocation2 + $0x118] sm:$0xff] %v3311_v0  ;;  %397 = vst [vmem:[#allocation2 + $0x98] sm:$0xff] %v3311_v0 }
  0x57   : > { %398 = vst [vmem:[#allocation2 + $0x120] sm:$0xff] %v3311_v0  ;;  %399 = vst [vmem:[#allocation2 + $0x150] sm:$0xff] %v3311_v0 }
  0x58   : > { %400 = vst [vmem:[#allocation2 + $0x108] sm:$0xff] %v3311_v0  ;;  %401 = vst [vmem:[#allocation2 + $0x60] sm:$0xff] %v3311_v0 }
  0x59   : > { %402 = vst [vmem:[#allocation2 + $0xe0] sm:$0xff] %v3311_v0  ;;  %403 = vst [vmem:[#allocation2 + $0x188] sm:$0xff] %v3311_v0 }
  0x5a   : > { %404 = vst [vmem:[#allocation2 + $0x138] sm:$0xff] %v3311_v0  ;;  %405 = vst [vmem:[#allocation2 + $0x140] sm:$0xff] %v3311_v0 }
  0x5b   : > { %406 = vst [vmem:[#allocation2 + $0x80] sm:$0xff] %v3311_v0  ;;  %407 = vst [vmem:[#allocation2 + $0x1a8] sm:$0xff] %v3311_v0 }
  0x5c   : > { %408 = vst [vmem:[#allocation2 + $0x1b8] sm:$0xff] %v3311_v0  ;;  %409 = vst [vmem:[#allocation2 + $0x28] sm:$0xff] %v3311_v0 }
  0x5d   : > { %410 = vst [vmem:[#allocation2 + $0x1e8] sm:$0xff] %v3311_v0  ;;  %411 = vst [vmem:[#allocation2 + $0xf8] sm:$0xff] %v3311_v0 }
  0x5e   : > { %412 = vst [vmem:[#allocation2 + $0x160] sm:$0xff] %v3311_v0  ;;  %413 = vst [vmem:[#allocation2 + $0x30] sm:$0xff] %v3311_v0 }
  0x5f   : > { %414 = vst [vmem:[#allocation2 + $0x1e0] sm:$0xff] %v3311_v0  ;;  %415 = vst [vmem:[#allocation2] sm:$0xff] %v3311_v0 }
  0x60   : > { %416 = vst [vmem:[#allocation2 + $0xf0] sm:$0xff] %v3311_v0  ;;  %417 = vst [vmem:[#allocation2 + $0x8] sm:$0xff] %v3311_v0 }
  0x61   : > { %418 = vst [vmem:[#allocation2 + $0x148] sm:$0xff] %v3311_v0  ;;  %419 = vst [vmem:[#allocation2 + $0x1d0] sm:$0xff] %v3311_v0 }
  0x62   : > { %420 = vst [vmem:[#allocation2 + $0x100] sm:$0xff] %v3311_v0  ;;  %421 = vst [vmem:[#allocation2 + $0xc8] sm:$0xff] %v3311_v0 }
  0x63   : > { %422 = vst [vmem:[#allocation2 + $0x40] sm:$0xff] %v3311_v0  ;;  %423 = vst [vmem:[#allocation2 + $0x1f8] sm:$0xff] %v3311_v0 }
  0x64   : > { %424 = vst [vmem:[#allocation2 + $0x20] sm:$0xff] %v3311_v0  ;;  %425 = vst [vmem:[#allocation2 + $0x128] sm:$0xff] %v3311_v0 }
  0x65   : > { %426 = vst [vmem:[#allocation2 + $0x1a0] sm:$0xff] %v3311_v0  ;;  %427 = vst [vmem:[#allocation2 + $0x1f0] sm:$0xff] %v3311_v0 }
  0x66   : > { %428 = vst [vmem:[#allocation2 + $0xe8] sm:$0xff] %v3311_v0  ;;  %429 = vst [vmem:[#allocation2 + $0x78] sm:$0xff] %v3311_v0 }
  0x67   : > { %430 = vst [vmem:[#allocation2 + $0x70] sm:$0xff] %v3311_v0  ;;  %431 = vst [vmem:[#allocation2 + $0x90] sm:$0xff] %v3311_v0 }
  0x68   : > { %432 = vst [vmem:[#allocation2 + $0x1d8] sm:$0xff] %v3311_v0  ;;  %433 = vst [vmem:[#allocation2 + $0xd0] sm:$0xff] %v3311_v0 }
  0x69   : > { %434 = vst [vmem:[#allocation2 + $0xb8] sm:$0xff] %v3311_v0  ;;  %435 = vst [vmem:[#allocation2 + $0x88] sm:$0xff] %v3311_v0 }
  0x6a   : > { %436 = vst [vmem:[#allocation2 + $0xa8] sm:$0xff] %v3311_v0  ;;  %437 = vst [vmem:[#allocation2 + $0x1c8] sm:$0xff] %v3311_v0 }
  0x6b   : > { %438 = vst [vmem:[#allocation2 + $0x170] sm:$0xff] %v3311_v0  ;;  %439 = vst [vmem:[#allocation2 + $0x178] sm:$0xff] %v3311_v0 }
  0x6c   : > { %440 = vst [vmem:[#allocation2 + $0x68] sm:$0xff] %v3311_v0  ;;  %441 = vst [vmem:[#allocation2 + $0x190] sm:$0xff] %v3311_v0 }
  0x6d   : > { %442 = vst [vmem:[#allocation2 + $0x198] sm:$0xff] %v3311_v0  ;;  %443 = vst [vmem:[#allocation2 + $0x38] sm:$0xff] %v3311_v0 }
  0x6e   : > { %444 = vst [vmem:[#allocation2 + $0xc0] sm:$0xff] %v3311_v0  ;;  %445 = vst [vmem:[#allocation2 + $0x1c0] sm:$0xff] %v3311_v0 }
  0x6f   : > { %446 = vst [vmem:[#allocation2 + $0x158] sm:$0xff] %v3311_v0  ;;  %447 = vst [vmem:[#allocation2 + $0x10] sm:$0xff] %v3311_v0 }
  0x70   : > { %448 = vst [vmem:[#allocation2 + $0x58] sm:$0xff] %v3311_v0  ;;  %449 = vst [vmem:[#allocation2 + $0xa0] sm:$0xff] %v3311_v0 }
  0x71 PF: > { %v2896_v1 = vld [vmem:[%s3483_s15 + $0x74] ss:$8 sps:$4 sm:$0xff]   ;;  %v2900_v3 = vld [vmem:[%s3483_s15 + $0x70] ss:$8 sps:$4 sm:$0xff]   ;;  %v2902_v5 = vld [vmem:[%s3483_s15 + $0x64] ss:$8 sps:$4 sm:$0xff]  }
  0x72   : > { %v2898_v2 = vld [vmem:[%s3483_s15 + $0x174] ss:$8 sps:$4 sm:$0xff]   ;;  %1038 = vmatprep.subr.bf16.mxu0 %v2896_v1  ;;  %v2901_v4 = vld [vmem:[%s3483_s15 + $0x170] ss:$8 sps:$4 sm:$0xff]   ;;  %v2904_v6 = vld [vmem:[%s3483_s15 + $0x164] ss:$8 sps:$4 sm:$0xff]  }
  0x73   : > { %1151 = vmatprep.subr.bf16.mxu1 %v2898_v2  ;;  %1039 = vmatpush1.bf16.msra.mxu0 %v2900_v3  ;;  %v2906_v7 = vld [vmem:[%s3483_s15 + $0x60] ss:$8 sps:$4 sm:$0xff]   ;;  %v2908_v9 = vld [vmem:[%s3483_s15 + $0x54] ss:$8 sps:$4 sm:$0xff]   ;;  %v2912_v11 = vld [vmem:[%s3483_s15 + $0x50] ss:$8 sps:$4 sm:$0xff]  }
  0x74   : > { %1152 = vmatpush1.bf16.msra.mxu1 %v2901_v4  ;;  %1040 = vmatprep.subr.bf16.mxu0 %v2902_v5  ;;  %v2907_v8 = vld [vmem:[%s3483_s15 + $0x160] ss:$8 sps:$4 sm:$0xff]   ;;  %v2910_v10 = vld [vmem:[%s3483_s15 + $0x154] ss:$8 sps:$4 sm:$0xff]   ;;  %v2913_v12 = vld [vmem:[%s3483_s15 + $0x150] ss:$8 sps:$4 sm:$0xff]  }
  0x75   : > { %1153 = vmatprep.subr.bf16.mxu1 %v2904_v6  ;;  %v2914_v13 = vld [vmem:[%s3483_s15 + $0x44] ss:$8 sps:$4 sm:$0xff]   ;;  %v2918_v15 = vld [vmem:[%s3483_s15 + $0x40] ss:$8 sps:$4 sm:$0xff]   ;;  %v2920_v17 = vld [vmem:[%s3483_s15 + $0x34] ss:$8 sps:$4 sm:$0xff]  }
  0x76   : > { %v2916_v14 = vld [vmem:[%s3483_s15 + $0x144] ss:$8 sps:$4 sm:$0xff]   ;;  %v2919_v16 = vld [vmem:[%s3483_s15 + $0x140] ss:$8 sps:$4 sm:$0xff]   ;;  %v2922_v18 = vld [vmem:[%s3483_s15 + $0x134] ss:$8 sps:$4 sm:$0xff]  }
  0x77   : > { %1041 = vmatpush1.bf16.msra.mxu0 %v2906_v7  ;;  %v2924_v19 = vld [vmem:[%s3483_s15 + $0x30] ss:$8 sps:$4 sm:$0xff]   ;;  %v2926_v21 = vld [vmem:[%s3483_s15 + $0x24] ss:$8 sps:$4 sm:$0xff]   ;;  %v2930_v23 = vld [vmem:[%s3483_s15 + $0x20] ss:$8 sps:$4 sm:$0xff]  }
  0x78   : > { %1154 = vmatpush1.bf16.msra.mxu1 %v2907_v8  ;;  %1042 = vmatprep.subr.bf16.mxu0 %v2908_v9  ;;  %v2925_v20 = vld [vmem:[%s3483_s15 + $0x130] ss:$8 sps:$4 sm:$0xff]   ;;  %v2928_v22 = vld [vmem:[%s3483_s15 + $0x124] ss:$8 sps:$4 sm:$0xff]   ;;  %v2931_v24 = vld [vmem:[%s3483_s15 + $0x120] ss:$8 sps:$4 sm:$0xff]  }
  0x79   : > { %1155 = vmatprep.subr.bf16.mxu1 %v2910_v10  ;;  %v2932_v25 = vld [vmem:[%s3483_s15 + $0x14] ss:$8 sps:$4 sm:$0xff]   ;;  %v2936_v27 = vld [vmem:[%s3483_s15 + $0x10] ss:$8 sps:$4 sm:$0xff]   ;;  %v2938_v29 = vld [vmem:[%s3483_s15 + $0x4] ss:$8 sps:$4 sm:$0xff]  }
  0x7a   : > { %v2934_v26 = vld [vmem:[%s3483_s15 + $0x114] ss:$8 sps:$4 sm:$0xff]   ;;  %v2937_v28 = vld [vmem:[%s3483_s15 + $0x110] ss:$8 sps:$4 sm:$0xff]   ;;  %v2940_v30 = vld [vmem:[%s3483_s15 + $0x104] ss:$8 sps:$4 sm:$0xff]  }
  0x7b   : > { %1043 = vmatpush1.bf16.msra.mxu0 %v2912_v11  ;;  %v2942_v31 = vld [vmem:[%s3483_s15] ss:$8 sps:$4 sm:$0xff]   ;;  %v2944_v33 = vld [vmem:[%s3483_s15 + $0xf4] ss:$8 sps:$4 sm:$0xff]   ;;  %v2948_v35 = vld [vmem:[%s3483_s15 + $0xf0] ss:$8 sps:$4 sm:$0xff]  }
  0x7c   : > { %1156 = vmatpush1.bf16.msra.mxu1 %v2913_v12  ;;  %1044 = vmatprep.subr.bf16.mxu0 %v2914_v13  ;;  %v2943_v32 = vld [vmem:[%s3483_s15 + $0x100] ss:$8 sps:$4 sm:$0xff]   ;;  %v2946_v34 = vld [vmem:[%s3483_s15 + $0x1f4] ss:$8 sps:$4 sm:$0xff]   ;;  %v2949_v36 = vld [vmem:[%s3483_s15 + $0x1f0] ss:$8 sps:$4 sm:$0xff]  }
  0x7d   : > { %1157 = vmatprep.subr.bf16.mxu1 %v2916_v14  ;;  %v2950_v37 = vld [vmem:[%s3483_s15 + $0xe4] ss:$8 sps:$4 sm:$0xff]   ;;  %v2954_v39 = vld [vmem:[%s3483_s15 + $0xe0] ss:$8 sps:$4 sm:$0xff]   ;;  %v2956_v41 = vld [vmem:[%s3483_s15 + $0xd4] ss:$8 sps:$4 sm:$0xff]  }
  0x7e   : > { %v2952_v38 = vld [vmem:[%s3483_s15 + $0x1e4] ss:$8 sps:$4 sm:$0xff]   ;;  %v2955_v40 = vld [vmem:[%s3483_s15 + $0x1e0] ss:$8 sps:$4 sm:$0xff]   ;;  %v2958_v42 = vld [vmem:[%s3483_s15 + $0x1d4] ss:$8 sps:$4 sm:$0xff]  }
  0x7f   : > { %1045 = vmatpush1.bf16.msra.mxu0 %v2918_v15  ;;  %v2960_v43 = vld [vmem:[%s3483_s15 + $0xd0] ss:$8 sps:$4 sm:$0xff]   ;;  %v2962_v45 = vld [vmem:[%s3483_s15 + $0xc4] ss:$8 sps:$4 sm:$0xff]   ;;  %v2966_v47 = vld [vmem:[%s3483_s15 + $0xc0] ss:$8 sps:$4 sm:$0xff]  }
  0x80   : > { %1158 = vmatpush1.bf16.msra.mxu1 %v2919_v16  ;;  %1046 = vmatprep.subr.bf16.mxu0 %v2920_v17  ;;  %v2961_v44 = vld [vmem:[%s3483_s15 + $0x1d0] ss:$8 sps:$4 sm:$0xff]   ;;  %v2964_v46 = vld [vmem:[%s3483_s15 + $0x1c4] ss:$8 sps:$4 sm:$0xff]   ;;  %v2967_v48 = vld [vmem:[%s3483_s15 + $0x1c0] ss:$8 sps:$4 sm:$0xff]  }
  0x81   : > { %1159 = vmatprep.subr.bf16.mxu1 %v2922_v18  ;;  %v2968_v49 = vld [vmem:[%s3483_s15 + $0xb4] ss:$8 sps:$4 sm:$0xff]   ;;  %v2972_v53 = vld [vmem:[%s3483_s15 + $0xb0] ss:$8 sps:$4 sm:$0xff]   ;;  %v2974_v55 = vld [vmem:[%s3483_s15 + $0xa4] ss:$8 sps:$4 sm:$0xff]  }
  0x82   : > { %v2994_v50 = vld [vmem:[#allocation3 + $0x4] ss:$16 sps:$4 sm:$0xff]   ;;  %v2997_v52 = vld [vmem:[#allocation3 + $0xc] ss:$16 sps:$4 sm:$0xff]   ;;  %v2973_v54 = vld [vmem:[%s3483_s15 + $0x1b0] ss:$8 sps:$4 sm:$0xff]  }
  0x83   : > { %1047 = vmatpush1.bf16.msra.mxu0 %v2924_v19  ;;  %v2970_v51 = vld [vmem:[%s3483_s15 + $0x1b4] ss:$8 sps:$4 sm:$0xff]   ;;  %1070 = vmatprep.mubr.bf16.mxu0 %v2994_v50  ;;  %v2976_v56 = vld [vmem:[%s3483_s15 + $0x1a4] ss:$8 sps:$4 sm:$0xff]   ;;  %v2978_v57 = vld [vmem:[%s3483_s15 + $0xa0] ss:$8 sps:$4 sm:$0xff]  }
  0x84   : > { %1160 = vmatpush1.bf16.msra.mxu1 %v2925_v20  ;;  %1048 = vmatprep.subr.bf16.mxu0 %v2926_v21  ;;  %v2979_v58 = vld [vmem:[%s3483_s15 + $0x1a0] ss:$8 sps:$4 sm:$0xff]   ;;  %v2980_v59 = vld [vmem:[%s3483_s15 + $0x94] ss:$8 sps:$4 sm:$0xff]   ;;  %v2984_v61 = vld [vmem:[%s3483_s15 + $0x90] ss:$8 sps:$4 sm:$0xff]  }
  0x85   : > { %1161 = vmatprep.subr.bf16.mxu1 %v2928_v22  ;;  %1183 = vmatprep.mubr.bf16.mxu1 %v2997_v52  ;;  %v2982_v60 = vld [vmem:[%s3483_s15 + $0x194] ss:$8 sps:$4 sm:$0xff]   ;;  %v2985_v62 = vld [vmem:[%s3483_s15 + $0x190] ss:$8 sps:$4 sm:$0xff]   ;;  %v2986_v63 = vld [vmem:[%s3483_s15 + $0x84] ss:$8 sps:$4 sm:$0xff]  }
  0x86   : > { %v2988_v0 = vld [vmem:[%s3483_s15 + $0x184] ss:$8 sps:$4 sm:$0xff]   ;;  %v2990_v1 = vld [vmem:[%s3483_s15 + $0x80] ss:$8 sps:$4 sm:$0xff]   ;;  %p2802_p2 = scmp.ne.s32.totalorder %s3294_s24, 1 }
  0x87   : > { %1049 = vmatpush1.bf16.msra.mxu0 %v2930_v23  ;;  %v2991_v2 = vld [vmem:[%s3483_s15 + $0x180] ss:$8 sps:$4 sm:$0xff]   ;;  %v2998_v5 = vld [vmem:[#allocation3 + $0x24] ss:$16 sps:$4 sm:$0xff]   ;;  %v3000_v6 = vld [vmem:[#allocation3 + $0x2c] ss:$16 sps:$4 sm:$0xff]  }
  0x88   : > { %1162 = vmatpush1.bf16.msra.mxu1 %v2931_v24  ;;  %1050 = vmatprep.subr.bf16.mxu0 %v2932_v25  ;;  %v2992_v3 = vld [vmem:[#allocation3] ss:$16 sps:$4 sm:$0xff]   ;;  %v2995_v4 = vld [vmem:[#allocation3 + $0x8] ss:$16 sps:$4 sm:$0xff]   ;;  %v3042_v8 = vld [vmem:[%s3496_s30 + $0xe4] ss:$16 sps:$4 sm:$0xff]  }
  0x89   : > { %1163 = vmatprep.subr.bf16.mxu1 %v2934_v26  ;;  %v3040_v7 = vld [vmem:[%s3496_s30 + $0xe0] ss:$16 sps:$4 sm:$0xff]   ;;  %v3043_v9 = vld [vmem:[%s3496_s30 + $0xe8] ss:$16 sps:$4 sm:$0xff]   ;;  %v3045_v10 = vld [vmem:[%s3496_s30 + $0xec] ss:$16 sps:$4 sm:$0xff]  }
  0x8a   : > { %v3048_v11 = vld [vmem:[%s3496_s30 + $0xc4] ss:$16 sps:$4 sm:$0xff]   ;;  %v3002_v12 = vld [vmem:[#allocation3 + $0x20] ss:$16 sps:$4 sm:$0xff]   ;;  %v3003_v13 = vld [vmem:[#allocation3 + $0x28] ss:$16 sps:$4 sm:$0xff]  }
  0x8b   : > { %1051 = vmatpush1.bf16.msra.mxu0 %v2936_v27  ;;  %v3051_v14 = vld [vmem:[%s3496_s30 + $0xcc] ss:$16 sps:$4 sm:$0xff]   ;;  %v3046_v15 = vld [vmem:[%s3496_s30 + $0xc0] ss:$16 sps:$4 sm:$0xff]   ;;  %v3049_v16 = vld [vmem:[%s3496_s30 + $0xc8] ss:$16 sps:$4 sm:$0xff]  }
  0x8c   : > { %1164 = vmatpush1.bf16.msra.mxu1 %v2937_v28  ;;  %1052 = vmatprep.subr.bf16.mxu0 %v2938_v29  ;;  %v3004_v17 = vld [vmem:[#allocation3 + $0x44] ss:$16 sps:$4 sm:$0xff]   ;;  %v3006_v18 = vld [vmem:[#allocation3 + $0x4c] ss:$16 sps:$4 sm:$0xff]   ;;  %v3052_v21 = vld [vmem:[%s3496_s30 + $0xa0] ss:$16 sps:$4 sm:$0xff]  }
  0x8d   : > { %1165 = vmatprep.subr.bf16.mxu1 %v2940_v30  ;;  %v3054_v19 = vld [vmem:[%s3496_s30 + $0xa4] ss:$16 sps:$4 sm:$0xff]   ;;  %v3057_v20 = vld [vmem:[%s3496_s30 + $0xac] ss:$16 sps:$4 sm:$0xff]   ;;  %v3055_v22 = vld [vmem:[%s3496_s30 + $0xa8] ss:$16 sps:$4 sm:$0xff]  }
  0x8e   : > { %v3060_v23 = vld [vmem:[%s3496_s30 + $0x84] ss:$16 sps:$4 sm:$0xff]   ;;  %v3063_v24 = vld [vmem:[%s3496_s30 + $0x8c] ss:$16 sps:$4 sm:$0xff]   ;;  %v3008_v25 = vld [vmem:[#allocation3 + $0x40] ss:$16 sps:$4 sm:$0xff]  }
  0x8f   : > { %1053 = vmatpush1.bf16.msra.mxu0 %v2942_v31  ;;  %v3009_v26 = vld [vmem:[#allocation3 + $0x48] ss:$16 sps:$4 sm:$0xff]   ;;  %v3058_v27 = vld [vmem:[%s3496_s30 + $0x80] ss:$16 sps:$4 sm:$0xff]   ;;  %v3010_v29 = vld [vmem:[#allocation3 + $0x64] ss:$16 sps:$4 sm:$0xff]  }
  0x90   : > { %1166 = vmatpush1.bf16.msra.mxu1 %v2943_v32  ;;  %1054 = vmatprep.subr.bf16.mxu0 %v2944_v33  ;;  %v3061_v28 = vld [vmem:[%s3496_s30 + $0x88] ss:$16 sps:$4 sm:$0xff]   ;;  %v3012_v30 = vld [vmem:[#allocation3 + $0x6c] ss:$16 sps:$4 sm:$0xff]   ;;  %v3066_v31 = vld [vmem:[%s3496_s30 + $0x64] ss:$16 sps:$4 sm:$0xff]  }
  0x91   : > { %1167 = vmatprep.subr.bf16.mxu1 %v2946_v34  ;;  %v3069_v32 = vld [vmem:[%s3496_s30 + $0x6c] ss:$16 sps:$4 sm:$0xff]   ;;  %v3064_v33 = vld [vmem:[%s3496_s30 + $0x60] ss:$16 sps:$4 sm:$0xff]   ;;  %v3067_v34 = vld [vmem:[%s3496_s30 + $0x68] ss:$16 sps:$4 sm:$0xff]  }
  0x92   : > { %v3021_v50 = vld [vmem:[#allocation3 + $0x88] ss:$16 sps:$4 sm:$0xff]  }
  0x93   : > { %1055 = vmatpush2.bf16.msra.mxu0 %v2948_v35  ;;  %v3072_v35 = vld [vmem:[%s3496_s30 + $0x44] ss:$16 sps:$4 sm:$0xff]   ;;  %v3085_v52 = vld [vmem:[%s3496_s30 + $0x8] ss:$16 sps:$4 sm:$0xff]  }
  0x94   : > { %1168 = vmatpush2.bf16.msra.mxu1 %v2949_v36  ;;  %1056 = vmatprep.subr.bf16.mxu0 %v2950_v37  ;;  %v3075_v36 = vld [vmem:[%s3496_s30 + $0x4c] ss:$16 sps:$4 sm:$0xff]   ;;  %v3014_v37 = vld [vmem:[#allocation3 + $0x60] ss:$16 sps:$4 sm:$0xff]  }
  0x95   : > { %1169 = vmatprep.subr.bf16.mxu1 %v2952_v38  ;;  %v3015_v38 = vld [vmem:[#allocation3 + $0x68] ss:$16 sps:$4 sm:$0xff]  }
  0x97   : > { %1057 = vmatpush2.bf16.msra.mxu0 %v2954_v39  ;;  %v3070_v39 = vld [vmem:[%s3496_s30 + $0x40] ss:$16 sps:$4 sm:$0xff]  }
  0x98   : > { %1170 = vmatpush2.bf16.msra.mxu1 %v2955_v40  ;;  %1058 = vmatprep.subr.bf16.mxu0 %v2956_v41  ;;  %v3073_v40 = vld [vmem:[%s3496_s30 + $0x48] ss:$16 sps:$4 sm:$0xff]   ;;  %v3016_v41 = vld [vmem:[#allocation3 + $0x84] ss:$16 sps:$4 sm:$0xff]  }
  0x99   : > { %1171 = vmatprep.subr.bf16.mxu1 %v2958_v42  ;;  %v3018_v42 = vld [vmem:[#allocation3 + $0x8c] ss:$16 sps:$4 sm:$0xff]  }
  0x9b   : > { %1059 = vmatpush2.bf16.msra.mxu0 %v2960_v43  ;;  %v3078_v43 = vld [vmem:[%s3496_s30 + $0x24] ss:$16 sps:$4 sm:$0xff]  }
  0x9c   : > { %1172 = vmatpush2.bf16.msra.mxu1 %v2961_v44  ;;  %1060 = vmatprep.subr.bf16.mxu0 %v2962_v45  ;;  %v3081_v44 = vld [vmem:[%s3496_s30 + $0x2c] ss:$16 sps:$4 sm:$0xff]   ;;  %v3076_v45 = vld [vmem:[%s3496_s30 + $0x20] ss:$16 sps:$4 sm:$0xff]  }
  0x9d   : > { %1173 = vmatprep.subr.bf16.mxu1 %v2964_v46  ;;  %v3079_v46 = vld [vmem:[%s3496_s30 + $0x28] ss:$16 sps:$4 sm:$0xff]  }
  0x9f   : > { %1061 = vmatpush2.bf16.msra.mxu0 %v2966_v47  ;;  %v3084_v47 = vld [vmem:[%s3496_s30 + $0x4] ss:$16 sps:$4 sm:$0xff]  }
  0xa0   : > { %1174 = vmatpush2.bf16.msra.mxu1 %v2967_v48  ;;  %1062 = vmatprep.subr.bf16.mxu0 %v2968_v49  ;;  %v3087_v48 = vld [vmem:[%s3496_s30 + $0xc] ss:$16 sps:$4 sm:$0xff]   ;;  %v3020_v49 = vld [vmem:[#allocation3 + $0x80] ss:$16 sps:$4 sm:$0xff]  }
  0xa1   : > { %1175 = vmatprep.subr.bf16.mxu1 %v2970_v51  ;;  %v3082_v51 = vld [vmem:[%s3496_s30] ss:$16 sps:$4 sm:$0xff]  }
  0xa3   : > { %1063 = vmatpush2.bf16.msra.mxu0 %v2972_v53  ;;  %v3022_v53 = vld [vmem:[#allocation3 + $0xa4] ss:$16 sps:$4 sm:$0xff]  }
  0xa4   : > { %1176 = vmatpush2.bf16.msra.mxu1 %v2973_v54  ;;  %1064 = vmatprep.subr.bf16.mxu0 %v2974_v55  ;;  %v3024_v54 = vld [vmem:[#allocation3 + $0xac] ss:$16 sps:$4 sm:$0xff]   ;;  %v3088_v55 = vld [vmem:[%s3496_s30 + $0x1e0] ss:$16 sps:$4 sm:$0xff]  }
  0xa5   : > { %1177 = vmatprep.subr.bf16.mxu1 %v2976_v56  ;;  %v3090_v56 = vld [vmem:[%s3496_s30 + $0x1e4] ss:$16 sps:$4 sm:$0xff]  }
  0xa7   : > { %1065 = vmatpush2.bf16.msra.mxu0 %v2978_v57  ;;  %v3093_v57 = vld [vmem:[%s3496_s30 + $0x1ec] ss:$16 sps:$4 sm:$0xff]  }
  0xa8   : > { %1178 = vmatpush2.bf16.msra.mxu1 %v2979_v58  ;;  %1066 = vmatprep.subr.bf16.mxu0 %v2980_v59  ;;  %v3091_v58 = vld [vmem:[%s3496_s30 + $0x1e8] ss:$16 sps:$4 sm:$0xff]   ;;  %v3096_v59 = vld [vmem:[%s3496_s30 + $0x1c4] ss:$16 sps:$4 sm:$0xff]  }
  0xa9   : > { %1179 = vmatprep.subr.bf16.mxu1 %v2982_v60  ;;  %v3099_v60 = vld [vmem:[%s3496_s30 + $0x1cc] ss:$16 sps:$4 sm:$0xff]  }
  0xab   : > { %1067 = vmatpush2.bf16.msra.mxu0 %v2984_v61  ;;  %v3094_v61 = vld [vmem:[%s3496_s30 + $0x1c0] ss:$16 sps:$4 sm:$0xff]  }
  0xac   : > { %1180 = vmatpush2.bf16.msra.mxu1 %v2985_v62  ;;  %1068 = vmatprep.subr.bf16.mxu0 %v2986_v63  ;;  %v3097_v62 = vld [vmem:[%s3496_s30 + $0x1c8] ss:$16 sps:$4 sm:$0xff]   ;;  %v3026_v63 = vld [vmem:[#allocation3 + $0xa0] ss:$16 sps:$4 sm:$0xff]  }
  0xad   : > { %1181 = vmatprep.subr.bf16.mxu1 %v2988_v0  ;;  %v3027_v0 = vld [vmem:[#allocation3 + $0xa8] ss:$16 sps:$4 sm:$0xff]  }
  0xaf   : > { %1069 = vmatpush2.bf16.msra.mxu0 %v2990_v1  ;;  %v3028_v1 = vld [vmem:[#allocation3 + $0xc4] ss:$16 sps:$4 sm:$0xff]  }
  0xb0   : > { %1182 = vmatpush2.bf16.msra.mxu1 %v2991_v2  ;;  %1760 = vmatprep.subr.bf16.mxu0 %v3042_v8  ;;  %v3030_v2 = vld [vmem:[#allocation3 + $0xcc] ss:$16 sps:$4 sm:$0xff]  }
  0xb1   : > { %1873 = vmatprep.subr.bf16.mxu1 %v3045_v10  ;;  %v3111_v8 = vld [vmem:[%s3496_s30 + $0x18c] ss:$16 sps:$4 sm:$0xff]   ;;  %v3109_v10 = vld [vmem:[%s3496_s30 + $0x188] ss:$16 sps:$4 sm:$0xff]  }
  0xb2   : > { %1071 = vmatmul.mubr.bf16.vlgmr.msra.gmra.mxu0 %v2992_v3  ;;  %v3102_v3 = vld [vmem:[%s3496_s30 + $0x1a4] ss:$16 sps:$4 sm:$0xff]  }
  0xb3   : > { %1184 = vmatmul.mubr.bf16.vlgmr.msra.gmra.mxu1 %v2995_v4  ;;  %1080 = vmatprep.mubr.bf16.mxu0 %v2998_v5  ;;  %v3105_v4 = vld [vmem:[%s3496_s30 + $0x1ac] ss:$16 sps:$4 sm:$0xff]   ;;  %v3100_v5 = vld [vmem:[%s3496_s30 + $0x1a0] ss:$16 sps:$4 sm:$0xff]  }
  0xb4   : > { %1193 = vmatprep.mubr.bf16.mxu1 %v3000_v6  ;;  %1761 = vmatpush1.bf16.msra.mxu0 %v3040_v7  ;;  %v3103_v6 = vld [vmem:[%s3496_s30 + $0x1a8] ss:$16 sps:$4 sm:$0xff]   ;;  %v3108_v7 = vld [vmem:[%s3496_s30 + $0x184] ss:$16 sps:$4 sm:$0xff]  }
  0xb5   : > { %1874 = vmatpush1.bf16.msra.mxu1 %v3043_v9  ;;  %1762 = vmatprep.subr.bf16.mxu0 %v3048_v11  ;;  %v3106_v9 = vld [vmem:[%s3496_s30 + $0x180] ss:$16 sps:$4 sm:$0xff]  }
  0xb6   : > { %1875 = vmatprep.subr.bf16.mxu1 %v3051_v14  ;;  %v3032_v11 = vld [vmem:[#allocation3 + $0xc0] ss:$16 sps:$4 sm:$0xff]   ;;  %v3036_v14 = vld [vmem:[#allocation3 + $0xec] ss:$16 sps:$4 sm:$0xff]  }
  0xb8   : > { %1763 = vmatpush1.bf16.msra.mxu0 %v3046_v15  ;;  %v3114_v15 = vld [vmem:[%s3496_s30 + $0x164] ss:$16 sps:$4 sm:$0xff]  }
  0xb9   : > { %1876 = vmatpush1.bf16.msra.mxu1 %v3049_v16  ;;  %1764 = vmatprep.subr.bf16.mxu0 %v3054_v19  ;;  %v3117_v16 = vld [vmem:[%s3496_s30 + $0x16c] ss:$16 sps:$4 sm:$0xff]   ;;  %v3038_v19 = vld [vmem:[#allocation3 + $0xe0] ss:$16 sps:$4 sm:$0xff]  }
  0xba   : > { %1081 = vmatmul.mubr.bf16.gmra.mxu0 %v3002_v12  ;;  %1877 = vmatprep.subr.bf16.mxu1 %v3057_v20  ;;  %v3033_v12 = vld [vmem:[#allocation3 + $0xc8] ss:$16 sps:$4 sm:$0xff]  }
  0xbb   : > { %1194 = vmatmul.mubr.bf16.gmra.mxu1 %v3003_v13  ;;  %1090 = vmatprep.mubr.bf16.mxu0 %v3004_v17  ;;  %v3034_v13 = vld [vmem:[#allocation3 + $0xe4] ss:$16 sps:$4 sm:$0xff]   ;;  %v3112_v17 = vld [vmem:[%s3496_s30 + $0x160] ss:$16 sps:$4 sm:$0xff]   ;;  %v3039_v20 = vld [vmem:[#allocation3 + $0xe8] ss:$16 sps:$4 sm:$0xff]  }
  0xbc   : > { %1203 = vmatprep.mubr.bf16.mxu1 %v3006_v18  ;;  %1765 = vmatpush1.bf16.msra.mxu0 %v3052_v21  ;;  %v3115_v18 = vld [vmem:[%s3496_s30 + $0x168] ss:$16 sps:$4 sm:$0xff]   ;;  %v3120_v21 = vld [vmem:[%s3496_s30 + $0x144] ss:$16 sps:$4 sm:$0xff]  }
  0xbd   : > { %1878 = vmatpush1.bf16.msra.mxu1 %v3055_v22  ;;  %1766 = vmatprep.subr.bf16.mxu0 %v3060_v23  ;;  %v3123_v22 = vld [vmem:[%s3496_s30 + $0x14c] ss:$16 sps:$4 sm:$0xff]   ;;  %v3118_v23 = vld [vmem:[%s3496_s30 + $0x140] ss:$16 sps:$4 sm:$0xff]  }
  0xbe   : > { %1879 = vmatprep.subr.bf16.mxu1 %v3063_v24  ;;  %v3121_v24 = vld [vmem:[%s3496_s30 + $0x148] ss:$16 sps:$4 sm:$0xff]  }
  0xc0   : > { %1767 = vmatpush1.bf16.msra.mxu0 %v3058_v27  ;;  %v3124_v27 = vld [vmem:[%s3496_s30 + $0x120] ss:$16 sps:$4 sm:$0xff]  }
  0xc1   : > { %1880 = vmatpush1.bf16.msra.mxu1 %v3061_v28  ;;  %1768 = vmatprep.subr.bf16.mxu0 %v3066_v31  ;;  %v3127_v28 = vld [vmem:[%s3496_s30 + $0x128] ss:$16 sps:$4 sm:$0xff]   ;;  %v3130_v31 = vld [vmem:[%s3496_s30 + $0x100] ss:$16 sps:$4 sm:$0xff]  }
  0xc2   : > { %1091 = vmatmul.mubr.bf16.gmra.mxu0 %v3008_v25  ;;  %1881 = vmatprep.subr.bf16.mxu1 %v3069_v32  ;;  %v3126_v25 = vld [vmem:[%s3496_s30 + $0x124] ss:$16 sps:$4 sm:$0xff]   ;;  %v3133_v32 = vld [vmem:[%s3496_s30 + $0x108] ss:$16 sps:$4 sm:$0xff]  }
  0xc3   : > { %1204 = vmatmul.mubr.bf16.gmra.mxu1 %v3009_v26  ;;  %1100 = vmatprep.mubr.bf16.mxu0 %v3010_v29  ;;  %v3129_v26 = vld [vmem:[%s3496_s30 + $0x12c] ss:$16 sps:$4 sm:$0xff]   ;;  %v3132_v29 = vld [vmem:[%s3496_s30 + $0x104] ss:$16 sps:$4 sm:$0xff]  }
  0xc4   : > { %1213 = vmatprep.mubr.bf16.mxu1 %v3012_v30  ;;  %1769 = vmatpush1.bf16.msra.mxu0 %v3064_v33  ;;  %v3135_v30 = vld [vmem:[%s3496_s30 + $0x10c] ss:$16 sps:$4 sm:$0xff]   ;;  %v548_v33 = vlaneseq }
  0xc5   : > { %1882 = vmatpush1.bf16.msra.mxu1 %v3067_v34  ;;  %1770 = vmatprep.subr.bf16.mxu0 %v3072_v35 }
  0xc6   : > { %1883 = vmatprep.subr.bf16.mxu1 %v3075_v36  ;;  %v3691_v34 = vshrl.u32 %v548_v33, 7 }
  0xc8   : > { %1771 = vmatpush1.bf16.msra.mxu0 %v3070_v39  ;;  %v554_v35 = vsub.s32 1, %v3691_v34  ;;  %v550_v36 = vsub.s32 0, %v3691_v34 }
  0xc9   : > { %1884 = vmatpush1.bf16.msra.mxu1 %v3073_v40  ;;  %1772 = vmatprep.subr.bf16.mxu0 %v3078_v43 }
  0xca   : > { %1101 = vmatmul.mubr.bf16.gmra.mxu0 %v3014_v37  ;;  %1885 = vmatprep.subr.bf16.mxu1 %v3081_v44  ;;  %v546_v37 = vld [vmem:[%s378_s18] sm:$0x3] }
  0xcb   : > { %1214 = vmatmul.mubr.bf16.gmra.mxu1 %v3015_v38  ;;  %1110 = vmatprep.mubr.bf16.mxu0 %v3016_v41  ;;  %v3702_v38 = vrot.slane %v546_v37, %v554_v35  ;;  %v3706_v39 = vrot.slane %v546_v37, %v550_v36 }
  0xcc   : > { %1223 = vmatprep.mubr.bf16.mxu1 %v3018_v42  ;;  %1773 = vmatpush1.bf16.msra.mxu0 %v3076_v45 }
  0xcd   : > { %1886 = vmatpush1.bf16.msra.mxu1 %v3079_v46  ;;  %1774 = vmatprep.subr.bf16.mxu0 %v3084_v47 }
  0xce   : > { %1887 = vmatprep.subr.bf16.mxu1 %v3087_v48 }
  0xd0   : > { %1775 = vmatpush1.bf16.msra.mxu0 %v3082_v51 }
  0xd1   : > { %1888 = vmatpush1.bf16.msra.mxu1 %v3085_v52  ;;  %1776 = vmatprep.subr.bf16.mxu0 %v3090_v56 }
  0xd2   : > { %1111 = vmatmul.mubr.bf16.gmra.mxu0 %v3020_v49  ;;  %1889 = vmatprep.subr.bf16.mxu1 %v3093_v57 }
  0xd3   : > { %1224 = vmatmul.mubr.bf16.gmra.mxu1 %v3021_v50  ;;  %1120 = vmatprep.mubr.bf16.mxu0 %v3022_v53 }
  0xd4   : > { %1233 = vmatprep.mubr.bf16.mxu1 %v3024_v54  ;;  %1777 = vmatpush2.bf16.msra.mxu0 %v3088_v55 }
  0xd5   : > { %1890 = vmatpush2.bf16.msra.mxu1 %v3091_v58  ;;  %1778 = vmatprep.subr.bf16.mxu0 %v3096_v59 }
  0xd6   : > { %1891 = vmatprep.subr.bf16.mxu1 %v3099_v60 }
  0xd8   : > { %1779 = vmatpush2.bf16.msra.mxu0 %v3094_v61 }
  0xd9   : > { %1892 = vmatpush2.bf16.msra.mxu1 %v3097_v62  ;;  %1780 = vmatprep.subr.bf16.mxu0 %v3102_v3 }
  0xda   : > { %1121 = vmatmul.mubr.bf16.gmra.mxu0 %v3026_v63  ;;  %1893 = vmatprep.subr.bf16.mxu1 %v3105_v4 }
  0xdb   : > { %1234 = vmatmul.mubr.bf16.gmra.mxu1 %v3027_v0  ;;  %1130 = vmatprep.mubr.bf16.mxu0 %v3028_v1 }
  0xdc   : > { %1243 = vmatprep.mubr.bf16.mxu1 %v3030_v2  ;;  %1781 = vmatpush2.bf16.msra.mxu0 %v3100_v5 }
  0xdd   : > { %1894 = vmatpush2.bf16.msra.mxu1 %v3103_v6  ;;  %1782 = vmatprep.subr.bf16.mxu0 %v3108_v7 }
  0xde   : > { %1895 = vmatprep.subr.bf16.mxu1 %v3111_v8 }
  0xe0   : > { %1783 = vmatpush2.bf16.msra.mxu0 %v3106_v9 }
  0xe1   : > { %1896 = vmatpush2.bf16.msra.mxu1 %v3109_v10  ;;  %1784 = vmatprep.subr.bf16.mxu0 %v3114_v15 }
  0xe2   : > { %1131 = vmatmul.mubr.bf16.gmra.mxu0 %v3032_v11  ;;  %1897 = vmatprep.subr.bf16.mxu1 %v3117_v16 }
  0xe3   : > { %1244 = vmatmul.mubr.bf16.gmra.mxu1 %v3033_v12  ;;  %1140 = vmatprep.mubr.bf16.mxu0 %v3034_v13 }
  0xe4   : > { %1253 = vmatprep.mubr.bf16.mxu1 %v3036_v14  ;;  %1785 = vmatpush2.bf16.msra.mxu0 %v3112_v17 }
  0xe5   : > { %1898 = vmatpush2.bf16.msra.mxu1 %v3115_v18  ;;  %1786 = vmatprep.subr.bf16.mxu0 %v3120_v21 }
  0xe6   : > { %1899 = vmatprep.subr.bf16.mxu1 %v3123_v22 }
  0xe8   : > { %1787 = vmatpush2.bf16.msra.mxu0 %v3118_v23 }
  0xe9   : > { %1900 = vmatpush2.bf16.msra.mxu1 %v3121_v24  ;;  %1788 = vmatprep.subr.bf16.mxu0 %v3126_v25 }
  0xea   : > { %1141 = vmatmul.mubr.bf16.gmra.mxu0 %v3038_v19  ;;  %1901 = vmatprep.subr.bf16.mxu1 %v3129_v26 }
  0xeb   : > { %1254 = vmatmul.mubr.bf16.gmra.mxu1 %v3039_v20 }
  0xec   : > { %1789 = vmatpush2.bf16.msra.mxu0 %v3124_v27 }
  0xed   : > { %1902 = vmatpush2.bf16.msra.mxu1 %v3127_v28  ;;  %1790 = vmatprep.subr.bf16.mxu0 %v3132_v29 }
  0xee   : > { %1903 = vmatprep.subr.bf16.mxu1 %v3135_v30 }
  0xf0   : > { %1791 = vmatpush2.bf16.msra.mxu0 %v3130_v31 }
  0xf1   : > { %1904 = vmatpush2.bf16.msra.mxu1 %v3133_v32 }
 0x172   : > { %v1072_v40 = vpop.f32.mrf.mxu0 }
 0x173   : > { %v1185_v41 = vpop.f32.mrf.mxu1  ;;  %v1073_v45 = vadd.f32 %v1072_v40, %v3706_v39 }
 0x174   : > { %v1074_v42 = vpop.f32.mrf.mxu0 }
 0x175   : > { %v1187_v43 = vpop.f32.mrf.mxu1  ;;  %v1075_v44 = vadd.f32 %v1074_v42, %v3702_v38  ;;  %v1186_v54 = vadd.f32 %v1185_v41, %v1073_v45 }
 0x176   : > { %v1076_v46 = vpop.f32.mrf.mxu0 }
 0x177   : > { %v1189_v47 = vpop.f32.mrf.mxu1  ;;  %v1077_v48 = vadd.f32 %v1076_v46, %v3706_v39  ;;  %v1188_v51 = vadd.f32 %v1187_v43, %v1075_v44  ;;  %v1264_v0 = vmax.f32 %v1186_v54, 0.0 }
 0x178   : > { %v1078_v49 = vpop.f32.mrf.mxu0 }
 0x179   : > { %v1191_v50 = vpop.f32.mrf.mxu1  ;;  %v1190_v52 = vadd.f32 %v1189_v47, %v1077_v48  ;;  %v1079_v53 = vadd.f32 %v1078_v49, %v3702_v38  ;;  %v1265_v61 = vmax.f32 %v1188_v51, 0.0 }
 0x17a   : > { %v1082_v55 = vpop.f32.mrf.mxu0 }
 0x17b   : > { %v1195_v56 = vpop.f32.mrf.mxu1  ;;  %v1192_v57 = vadd.f32 %v1191_v50, %v1079_v53  ;;  %v1266_v58 = vmax.f32 %v1190_v52, 0.0  ;;  %v1083_v1 = vadd.f32 %v1082_v55, %v3706_v39 }
 0x17c   : > { %v1084_v59 = vpop.f32.mrf.mxu0 }
 0x17d   : > { %v1197_v60 = vpop.f32.mrf.mxu1  ;;  %v1267_v62 = vmax.f32 %v1192_v57, 0.0  ;;  %v1085_v63 = vadd.f32 %v1084_v59, %v3702_v38  ;;  %v1360_v6 = vpack.c.bf16 %v1266_v58, %v1264_v0  ;;  %v1196_v12 = vadd.f32 %v1195_v56, %v1083_v1 }
 0x17e   : > { %v1086_v2 = vpop.f32.mrf.mxu0 }
 0x17f   : > { %v1199_v3 = vpop.f32.mrf.mxu1  ;;  %v1361_v4 = vpack.c.bf16 %v1267_v62, %v1265_v61  ;;  %v1087_v5 = vadd.f32 %v1086_v2, %v3706_v39  ;;  %v1198_v9 = vadd.f32 %v1197_v60, %v1085_v63  ;;  %v1268_v22 = vmax.f32 %v1196_v12, 0.0 }
 0x180   : > { %v1088_v7 = vpop.f32.mrf.mxu0 }
 0x181   : > { %v1201_v8 = vpop.f32.mrf.mxu1  ;;  %v1200_v10 = vadd.f32 %v1199_v3, %v1087_v5  ;;  %v1089_v11 = vadd.f32 %v1088_v7, %v3702_v38  ;;  %1792 = vmatprep.mubr.bf16.mxu0 %v1361_v4  ;;  %1905 = vmatprep.mubr.bf16.mxu1 %v1361_v4  ;;  %v1269_v19 = vmax.f32 %v1198_v9, 0.0 }
 0x182   : > { %v1092_v13 = vpop.f32.mrf.mxu0  ;;  %1793 = vmatmul.mubr.bf16.vlgmr.msra.gmra.mxu0 %v1360_v6  ;;  %1906 = vmatmul.mubr.bf16.vlgmr.msra.gmra.mxu1 %v1360_v6 }
 0x183   : > { %v1205_v14 = vpop.f32.mrf.mxu1  ;;  %v1202_v15 = vadd.f32 %v1201_v8, %v1089_v11  ;;  %v1270_v16 = vmax.f32 %v1200_v10, 0.0  ;;  %v1093_v23 = vadd.f32 %v1092_v13, %v3706_v39 }
 0x184   : > { %v1094_v17 = vpop.f32.mrf.mxu0 }
 0x185   : > { %v1207_v18 = vpop.f32.mrf.mxu1  ;;  %v1271_v20 = vmax.f32 %v1202_v15, 0.0  ;;  %v1095_v21 = vadd.f32 %v1094_v17, %v3702_v38  ;;  %v1362_v28 = vpack.c.bf16 %v1270_v16, %v1268_v22  ;;  %v1206_v37 = vadd.f32 %v1205_v14, %v1093_v23 }
 0x186   : > { %v1096_v24 = vpop.f32.mrf.mxu0 }
 0x187   : > { %v1209_v25 = vpop.f32.mrf.mxu1  ;;  %v1363_v26 = vpack.c.bf16 %v1271_v20, %v1269_v19  ;;  %v1097_v27 = vadd.f32 %v1096_v24, %v3706_v39  ;;  %v1208_v31 = vadd.f32 %v1207_v18, %v1095_v21  ;;  %v1272_v49 = vmax.f32 %v1206_v37, 0.0 }
 0x188   : > { %v1098_v29 = vpop.f32.mrf.mxu0 }
 0x189   : > { %v1211_v30 = vpop.f32.mrf.mxu1  ;;  %v1210_v32 = vadd.f32 %v1209_v25, %v1097_v27  ;;  %v1099_v33 = vadd.f32 %v1098_v29, %v3702_v38  ;;  %1802 = vmatprep.mubr.bf16.mxu0 %v1363_v26  ;;  %1915 = vmatprep.mubr.bf16.mxu1 %v1363_v26  ;;  %v1273_v46 = vmax.f32 %v1208_v31, 0.0 }
 0x18a   : > { %v1102_v40 = vpop.f32.mrf.mxu0  ;;  %1803 = vmatmul.mubr.bf16.gmra.mxu0 %v1362_v28  ;;  %1916 = vmatmul.mubr.bf16.gmra.mxu1 %v1362_v28 }
 0x18b   : > { %v1215_v41 = vpop.f32.mrf.mxu1  ;;  %v1212_v42 = vadd.f32 %v1211_v30, %v1099_v33  ;;  %v1274_v43 = vmax.f32 %v1210_v32, 0.0  ;;  %v1103_v50 = vadd.f32 %v1102_v40, %v3706_v39 }
 0x18c   : > { %v1104_v44 = vpop.f32.mrf.mxu0 }
 0x18d   : > { %v1217_v45 = vpop.f32.mrf.mxu1  ;;  %v1275_v47 = vmax.f32 %v1212_v42, 0.0  ;;  %v1105_v48 = vadd.f32 %v1104_v44, %v3702_v38  ;;  %v1364_v55 = vpack.c.bf16 %v1274_v43, %v1272_v49  ;;  %v1216_v61 = vadd.f32 %v1215_v41, %v1103_v50 }
 0x18e   : > { %v1106_v51 = vpop.f32.mrf.mxu0 }
 0x18f   : > { %v1219_v52 = vpop.f32.mrf.mxu1  ;;  %v1365_v53 = vpack.c.bf16 %v1275_v47, %v1273_v46  ;;  %v1107_v54 = vadd.f32 %v1106_v51, %v3706_v39  ;;  %v1218_v58 = vadd.f32 %v1217_v45, %v1105_v48  ;;  %v1276_v7 = vmax.f32 %v1216_v61, 0.0 }
 0x190   : > { %v1108_v56 = vpop.f32.mrf.mxu0 }
 0x191   : > { %v1221_v57 = vpop.f32.mrf.mxu1  ;;  %v1220_v59 = vadd.f32 %v1219_v52, %v1107_v54  ;;  %v1109_v60 = vadd.f32 %v1108_v56, %v3702_v38  ;;  %1812 = vmatprep.mubr.bf16.mxu0 %v1365_v53  ;;  %1925 = vmatprep.mubr.bf16.mxu1 %v1365_v53  ;;  %v1277_v4 = vmax.f32 %v1218_v58, 0.0 }
 0x192   : > { %v1112_v62 = vpop.f32.mrf.mxu0  ;;  %1813 = vmatmul.mubr.bf16.gmra.mxu0 %v1364_v55  ;;  %1926 = vmatmul.mubr.bf16.gmra.mxu1 %v1364_v55 }
 0x193   : > { %v1225_v63 = vpop.f32.mrf.mxu1  ;;  %v1222_v0 = vadd.f32 %v1221_v57, %v1109_v60  ;;  %v1278_v1 = vmax.f32 %v1220_v59, 0.0  ;;  %v1113_v8 = vadd.f32 %v1112_v62, %v3706_v39 }
 0x194   : > { %v1114_v2 = vpop.f32.mrf.mxu0 }
 0x195   : > { %v1227_v3 = vpop.f32.mrf.mxu1  ;;  %v1279_v5 = vmax.f32 %v1222_v0, 0.0  ;;  %v1115_v6 = vadd.f32 %v1114_v2, %v3702_v38  ;;  %v1366_v13 = vpack.c.bf16 %v1278_v1, %v1276_v7  ;;  %v1226_v19 = vadd.f32 %v1225_v63, %v1113_v8 }
 0x196   : > { %v1116_v9 = vpop.f32.mrf.mxu0 }
 0x197   : > { %v1229_v10 = vpop.f32.mrf.mxu1  ;;  %v1367_v11 = vpack.c.bf16 %v1279_v5, %v1277_v4  ;;  %v1117_v12 = vadd.f32 %v1116_v9, %v3706_v39  ;;  %v1228_v16 = vadd.f32 %v1227_v3, %v1115_v6  ;;  %v1280_v29 = vmax.f32 %v1226_v19, 0.0 }
 0x198   : > { %v1118_v14 = vpop.f32.mrf.mxu0 }
 0x199   : > { %v1231_v15 = vpop.f32.mrf.mxu1  ;;  %v1230_v17 = vadd.f32 %v1229_v10, %v1117_v12  ;;  %v1119_v18 = vadd.f32 %v1118_v14, %v3702_v38  ;;  %1822 = vmatprep.mubr.bf16.mxu0 %v1367_v11  ;;  %1935 = vmatprep.mubr.bf16.mxu1 %v1367_v11  ;;  %v1281_v26 = vmax.f32 %v1228_v16, 0.0 }
 0x19a   : > { %v1122_v20 = vpop.f32.mrf.mxu0  ;;  %1823 = vmatmul.mubr.bf16.gmra.mxu0 %v1366_v13  ;;  %1936 = vmatmul.mubr.bf16.gmra.mxu1 %v1366_v13 }
 0x19b   : > { %v1235_v21 = vpop.f32.mrf.mxu1  ;;  %v1232_v22 = vadd.f32 %v1231_v15, %v1119_v18  ;;  %v1282_v23 = vmax.f32 %v1230_v17, 0.0  ;;  %v1123_v30 = vadd.f32 %v1122_v20, %v3706_v39 }
 0x19c   : > { %v1124_v24 = vpop.f32.mrf.mxu0 }
 0x19d   : > { %v1237_v25 = vpop.f32.mrf.mxu1  ;;  %v1283_v27 = vmax.f32 %v1232_v22, 0.0  ;;  %v1125_v28 = vadd.f32 %v1124_v24, %v3702_v38  ;;  %v1368_v40 = vpack.c.bf16 %v1282_v23, %v1280_v29  ;;  %v1236_v46 = vadd.f32 %v1235_v21, %v1123_v30 }
 0x19e   : > { %v1126_v31 = vpop.f32.mrf.mxu0 }
 0x19f   : > { %v1239_v32 = vpop.f32.mrf.mxu1  ;;  %v1369_v33 = vpack.c.bf16 %v1283_v27, %v1281_v26  ;;  %v1127_v37 = vadd.f32 %v1126_v31, %v3706_v39  ;;  %v1238_v43 = vadd.f32 %v1237_v25, %v1125_v28  ;;  %v1284_v56 = vmax.f32 %v1236_v46, 0.0 }
 0x1a0   : > { %v1128_v41 = vpop.f32.mrf.mxu0 }
 0x1a1   : > { %v1241_v42 = vpop.f32.mrf.mxu1  ;;  %v1240_v44 = vadd.f32 %v1239_v32, %v1127_v37  ;;  %v1129_v45 = vadd.f32 %v1128_v41, %v3702_v38  ;;  %1832 = vmatprep.mubr.bf16.mxu0 %v1369_v33  ;;  %1945 = vmatprep.mubr.bf16.mxu1 %v1369_v33  ;;  %v1285_v53 = vmax.f32 %v1238_v43, 0.0  ;;  %v1298_v37 = vld [vmem:[#allocation2 + $0xd8] sm:$0xff]  ;;  %v1297_v41 = vld [vmem:[#allocation2 + $0x1b0] sm:$0xff] }
 0x1a2   : > { %v1132_v47 = vpop.f32.mrf.mxu0  ;;  %1833 = vmatmul.mubr.bf16.gmra.mxu0 %v1368_v40  ;;  %1946 = vmatmul.mubr.bf16.gmra.mxu1 %v1368_v40 }
 0x1a3   : > { %v1245_v48 = vpop.f32.mrf.mxu1  ;;  %v1242_v49 = vadd.f32 %v1241_v42, %v1129_v45  ;;  %v1286_v50 = vmax.f32 %v1240_v44, 0.0  ;;  %v1133_v57 = vadd.f32 %v1132_v47, %v3706_v39  ;;  %v1299_v42 = vld [vmem:[#allocation2 + $0x18] sm:$0xff]  ;;  %v1300_v47 = vld [vmem:[#allocation2 + $0x50] sm:$0xff] }
 0x1a4   : > { %v1134_v51 = vpop.f32.mrf.mxu0 }
 0x1a5   : > { %v1247_v52 = vpop.f32.mrf.mxu1  ;;  %v1287_v54 = vmax.f32 %v1242_v49, 0.0  ;;  %v1135_v55 = vadd.f32 %v1134_v51, %v3702_v38  ;;  %v1370_v62 = vpack.c.bf16 %v1286_v50, %v1284_v56  ;;  %v1246_v4 = vadd.f32 %v1245_v48, %v1133_v57  ;;  %v1302_v48 = vld [vmem:[#allocation2 + $0x130] sm:$0xff] }
 0x1a6   : > { %v1136_v58 = vpop.f32.mrf.mxu0 }
 0x1a7   : > { %v1249_v59 = vpop.f32.mrf.mxu1  ;;  %v1371_v60 = vpack.c.bf16 %v1287_v54, %v1285_v53  ;;  %v1137_v61 = vadd.f32 %v1136_v58, %v3706_v39  ;;  %v1248_v1 = vadd.f32 %v1247_v52, %v1135_v55  ;;  %v1288_v14 = vmax.f32 %v1246_v4, 0.0  ;;  %v1301_v53 = vld [vmem:[#allocation2 + $0x168] sm:$0xff] }
 0x1a8   : > { %v1138_v63 = vpop.f32.mrf.mxu0  ;;  %v1303_v54 = vld [vmem:[#allocation2 + $0x48] sm:$0xff] }
 0x1a9   : > { %v1251_v0 = vpop.f32.mrf.mxu1  ;;  %v1250_v2 = vadd.f32 %v1249_v59, %v1137_v61  ;;  %v1139_v3 = vadd.f32 %v1138_v63, %v3702_v38  ;;  %1842 = vmatprep.mubr.bf16.mxu0 %v1371_v60  ;;  %1955 = vmatprep.mubr.bf16.mxu1 %v1371_v60  ;;  %v1289_v11 = vmax.f32 %v1248_v1, 0.0  ;;  %v1304_v59 = vld [vmem:[#allocation2 + $0x180] sm:$0xff]  ;;  %v1306_v60 = vld [vmem:[#allocation2 + $0x118] sm:$0xff]  ;;  %v1305_v1 = vld [vmem:[#allocation2 + $0x110] sm:$0xff] }
 0x1aa   : > { %v1142_v5 = vpop.f32.mrf.mxu0  ;;  %1843 = vmatmul.mubr.bf16.gmra.mxu0 %v1370_v62  ;;  %1956 = vmatmul.mubr.bf16.gmra.mxu1 %v1370_v62 }
 0x1ab   : > { %v1255_v6 = vpop.f32.mrf.mxu1  ;;  %v1252_v7 = vadd.f32 %v1251_v0, %v1139_v3  ;;  %v1290_v8 = vmax.f32 %v1250_v2, 0.0  ;;  %v1143_v15 = vadd.f32 %v1142_v5, %v3706_v39  ;;  %v1307_v2 = vld [vmem:[#allocation2 + $0x98] sm:$0xff] }
 0x1ac   : > { %v1144_v9 = vpop.f32.mrf.mxu0 }
 0x1ad   : > { %v1257_v10 = vpop.f32.mrf.mxu1  ;;  %v1291_v12 = vmax.f32 %v1252_v7, 0.0  ;;  %v1145_v13 = vadd.f32 %v1144_v9, %v3702_v38  ;;  %v1372_v20 = vpack.c.bf16 %v1290_v8, %v1288_v14  ;;  %v1256_v25 = vadd.f32 %v1255_v6, %v1143_v15  ;;  %v1308_v7 = vld [vmem:[#allocation2 + $0x120] sm:$0xff]  ;;  %v1310_v8 = vld [vmem:[#allocation2 + $0x108] sm:$0xff] }
 0x1ae   : > { %v1146_v16 = vpop.f32.mrf.mxu0  ;;  %v1311_v14 = vld [vmem:[#allocation2 + $0x60] sm:$0xff] }
 0x1af   : > { %v1259_v17 = vpop.f32.mrf.mxu1  ;;  %v1373_v18 = vpack.c.bf16 %v1291_v12, %v1289_v11  ;;  %v1147_v19 = vadd.f32 %v1146_v16, %v3706_v39  ;;  %v1258_v22 = vadd.f32 %v1257_v10, %v1145_v13  ;;  %v1292_v31 = vmax.f32 %v1256_v25, 0.0  ;;  %v1296_v39 = vld [vmem:[#allocation2 + $0xb0] sm:$0xff]  ;;  %v1313_v25 = vld [vmem:[#allocation2 + $0x188] sm:$0xff] }
 0x1b0   : > { %v1148_v21 = vpop.f32.mrf.mxu0  ;;  %v1309_v13 = vld [vmem:[#allocation2 + $0x150] sm:$0xff] }
 0x1b1   : > { %v1260_v23 = vadd.f32 %v1259_v17, %v1147_v19  ;;  %v1149_v24 = vadd.f32 %v1148_v21, %v3702_v38  ;;  %1852 = vmatprep.mubr.bf16.mxu0 %v1373_v18  ;;  %1965 = vmatprep.mubr.bf16.mxu1 %v1373_v18  ;;  %v1261_v26 = vpop.f32.mrf.mxu1  ;;  %v1293_v29 = vmax.f32 %v1258_v22, 0.0  ;;  %v1312_v19 = vld [vmem:[#allocation2 + $0xe0] sm:$0xff] }
 0x1b2   : > { %1853 = vmatmul.mubr.bf16.gmra.mxu0 %v1372_v20  ;;  %1966 = vmatmul.mubr.bf16.gmra.mxu1 %v1372_v20  ;;  %v1314_v20 = vld [vmem:[#allocation2 + $0x138] sm:$0xff] }
 0x1b3   : > { %v1262_v27 = vadd.f32 %v1261_v26, %v1149_v24  ;;  %v1294_v28 = vmax.f32 %v1260_v23, 0.0  ;;  %v1315_v26 = vld [vmem:[#allocation2 + $0x140] sm:$0xff] }
 0x1b5   : > { %v1295_v30 = vmax.f32 %v1262_v27, 0.0  ;;  %v1374_v33 = vpack.c.bf16 %v1294_v28, %v1292_v31  ;;  %v1316_v31 = vld [vmem:[#allocation2 + $0x80] sm:$0xff] }
 0x1b7   : > { %v1375_v32 = vpack.c.bf16 %v1295_v30, %v1293_v29 }
 0x1b9   : > { %1862 = vmatprep.mubr.bf16.mxu0 %v1375_v32  ;;  %1975 = vmatprep.mubr.bf16.mxu1 %v1375_v32  ;;  %v1318_v32 = vld [vmem:[#allocation2 + $0x1b8] sm:$0xff] }
 0x1ba   : > { %1863 = vmatmul.mubr.bf16.gmra.mxu0 %v1374_v33  ;;  %1976 = vmatmul.mubr.bf16.gmra.mxu1 %v1374_v33 }
 0x242   : > { %v1794_v38 = vpop.f32.mrf.mxu0  ;;  %v1907_v40 = vpop.f32.mrf.mxu1 }
 0x243   : > { %v1986_v43 = vadd.f32 %v1794_v38, %v1296_v39  ;;  %v1988_v44 = vadd.f32 %v1907_v40, %v1298_v37  ;;  %v1317_v40 = vld [vmem:[#allocation2 + $0x1a8] sm:$0xff] }
 0x244   : > { %v1796_v45 = vpop.f32.mrf.mxu0  ;;  %v1909_v46 = vpop.f32.mrf.mxu1 }
 0x245   : > { %2050 = vst [vmem:[#allocation2 + $0xb0] sm:$0xff] %v1986_v43  ;;  %2052 = vst [vmem:[#allocation2 + $0xd8] sm:$0xff] %v1988_v44  ;;  %v1987_v49 = vadd.f32 %v1796_v45, %v1297_v41  ;;  %v1989_v50 = vadd.f32 %v1909_v46, %v1299_v42  ;;  %v1319_v41 = vld [vmem:[#allocation2 + $0x28] sm:$0xff] }
 0x246   : > { %v1798_v51 = vpop.f32.mrf.mxu0  ;;  %v1911_v52 = vpop.f32.mrf.mxu1  ;;  %v1320_v46 = vld [vmem:[#allocation2 + $0x1e8] sm:$0xff] }
 0x247   : > { %2051 = vst [vmem:[#allocation2 + $0x1b0] sm:$0xff] %v1987_v49  ;;  %2053 = vst [vmem:[#allocation2 + $0x18] sm:$0xff] %v1989_v50  ;;  %v1990_v55 = vadd.f32 %v1798_v51, %v1300_v47  ;;  %v1992_v56 = vadd.f32 %v1911_v52, %v1302_v48  ;;  %v1322_v47 = vld [vmem:[#allocation2 + $0x160] sm:$0xff]  ;;  %v1321_v52 = vld [vmem:[#allocation2 + $0xf8] sm:$0xff] }
 0x248   : > { %v1800_v57 = vpop.f32.mrf.mxu0  ;;  %v1913_v58 = vpop.f32.mrf.mxu1 }
 0x249   : > { %2054 = vst [vmem:[#allocation2 + $0x50] sm:$0xff] %v1990_v55  ;;  %2056 = vst [vmem:[#allocation2 + $0x130] sm:$0xff] %v1992_v56  ;;  %v1991_v61 = vadd.f32 %v1800_v57, %v1301_v53  ;;  %v1993_v62 = vadd.f32 %v1913_v58, %v1303_v54  ;;  %v1323_v53 = vld [vmem:[#allocation2 + $0x30] sm:$0xff]  ;;  %v1324_v58 = vld [vmem:[#allocation2 + $0x1e0] sm:$0xff] }
 0x24a   : > { %v1804_v63 = vpop.f32.mrf.mxu0  ;;  %v1917_v0 = vpop.f32.mrf.mxu1 }
 0x24b   : > { %2055 = vst [vmem:[#allocation2 + $0x168] sm:$0xff] %v1991_v61  ;;  %2057 = vst [vmem:[#allocation2 + $0x48] sm:$0xff] %v1993_v62  ;;  %v1994_v3 = vadd.f32 %v1804_v63, %v1304_v59  ;;  %v1996_v4 = vadd.f32 %v1917_v0, %v1306_v60  ;;  %v1326_v59 = vld [vmem:[#allocation2 + $0xf0] sm:$0xff]  ;;  %v1325_v0 = vld [vmem:[#allocation2] sm:$0xff] }
 0x24c   : > { %v1806_v5 = vpop.f32.mrf.mxu0  ;;  %v1919_v6 = vpop.f32.mrf.mxu1 }
 0x24d   : > { %2058 = vst [vmem:[#allocation2 + $0x180] sm:$0xff] %v1994_v3  ;;  %2060 = vst [vmem:[#allocation2 + $0x118] sm:$0xff] %v1996_v4  ;;  %v1995_v9 = vadd.f32 %v1806_v5, %v1305_v1  ;;  %v1997_v10 = vadd.f32 %v1919_v6, %v1307_v2  ;;  %v1327_v1 = vld [vmem:[#allocation2 + $0x8] sm:$0xff] }
 0x24e   : > { %v1808_v11 = vpop.f32.mrf.mxu0  ;;  %v1921_v12 = vpop.f32.mrf.mxu1  ;;  %v1328_v6 = vld [vmem:[#allocation2 + $0x148] sm:$0xff] }
 0x24f   : > { %2059 = vst [vmem:[#allocation2 + $0x110] sm:$0xff] %v1995_v9  ;;  %2061 = vst [vmem:[#allocation2 + $0x98] sm:$0xff] %v1997_v10  ;;  %v1998_v15 = vadd.f32 %v1808_v11, %v1308_v7  ;;  %v2000_v16 = vadd.f32 %v1921_v12, %v1310_v8  ;;  %v1330_v7 = vld [vmem:[#allocation2 + $0x100] sm:$0xff]  ;;  %v1329_v12 = vld [vmem:[#allocation2 + $0x1d0] sm:$0xff] }
 0x250   : > { %v1810_v17 = vpop.f32.mrf.mxu0  ;;  %v1923_v18 = vpop.f32.mrf.mxu1 }
 0x251   : > { %2062 = vst [vmem:[#allocation2 + $0x120] sm:$0xff] %v1998_v15  ;;  %2064 = vst [vmem:[#allocation2 + $0x108] sm:$0xff] %v2000_v16  ;;  %v1999_v21 = vadd.f32 %v1810_v17, %v1309_v13  ;;  %v2001_v22 = vadd.f32 %v1923_v18, %v1311_v14  ;;  %v1331_v13 = vld [vmem:[#allocation2 + $0xc8] sm:$0xff]  ;;  %v1332_v18 = vld [vmem:[#allocation2 + $0x40] sm:$0xff] }
 0x252   : > { %v1814_v23 = vpop.f32.mrf.mxu0  ;;  %v1927_v24 = vpop.f32.mrf.mxu1 }
 0x253   : > { %2063 = vst [vmem:[#allocation2 + $0x150] sm:$0xff] %v1999_v21  ;;  %2065 = vst [vmem:[#allocation2 + $0x60] sm:$0xff] %v2001_v22  ;;  %v2002_v27 = vadd.f32 %v1814_v23, %v1312_v19  ;;  %v2004_v28 = vadd.f32 %v1927_v24, %v1314_v20  ;;  %v1334_v19 = vld [vmem:[#allocation2 + $0x20] sm:$0xff]  ;;  %v1333_v24 = vld [vmem:[#allocation2 + $0x1f8] sm:$0xff] }
 0x254   : > { %v1816_v29 = vpop.f32.mrf.mxu0  ;;  %v1929_v30 = vpop.f32.mrf.mxu1 }
 0x255   : > { %2066 = vst [vmem:[#allocation2 + $0xe0] sm:$0xff] %v2002_v27  ;;  %2068 = vst [vmem:[#allocation2 + $0x138] sm:$0xff] %v2004_v28  ;;  %v2003_v33 = vadd.f32 %v1816_v29, %v1313_v25  ;;  %v2005_v39 = vadd.f32 %v1929_v30, %v1315_v26  ;;  %v1335_v25 = vld [vmem:[#allocation2 + $0x128] sm:$0xff]  ;;  %v1336_v30 = vld [vmem:[#allocation2 + $0x1a0] sm:$0xff] }
 0x256   : > { %v1818_v37 = vpop.f32.mrf.mxu0  ;;  %v1931_v38 = vpop.f32.mrf.mxu1 }
 0x257   : > { %2067 = vst [vmem:[#allocation2 + $0x188] sm:$0xff] %v2003_v33  ;;  %2069 = vst [vmem:[#allocation2 + $0x140] sm:$0xff] %v2005_v39  ;;  %v2006_v42 = vadd.f32 %v1818_v37, %v1316_v31  ;;  %v2008_v43 = vadd.f32 %v1931_v38, %v1318_v32  ;;  %v1338_v31 = vld [vmem:[#allocation2 + $0xe8] sm:$0xff]  ;;  %v1337_v38 = vld [vmem:[#allocation2 + $0x1f0] sm:$0xff] }
 0x258   : > { %v1820_v44 = vpop.f32.mrf.mxu0  ;;  %v1933_v45 = vpop.f32.mrf.mxu1 }
 0x259   : > { %2070 = vst [vmem:[#allocation2 + $0x80] sm:$0xff] %v2006_v42  ;;  %2072 = vst [vmem:[#allocation2 + $0x1b8] sm:$0xff] %v2008_v43  ;;  %v2007_v48 = vadd.f32 %v1820_v44, %v1317_v40  ;;  %v2009_v49 = vadd.f32 %v1933_v45, %v1319_v41  ;;  %v1339_v40 = vld [vmem:[#allocation2 + $0x78] sm:$0xff]  ;;  %v1340_v45 = vld [vmem:[#allocation2 + $0x70] sm:$0xff] }
 0x25a   : > { %v1824_v50 = vpop.f32.mrf.mxu0  ;;  %v1937_v51 = vpop.f32.mrf.mxu1 }
 0x25b   : > { %2071 = vst [vmem:[#allocation2 + $0x1a8] sm:$0xff] %v2007_v48  ;;  %2073 = vst [vmem:[#allocation2 + $0x28] sm:$0xff] %v2009_v49  ;;  %v2010_v54 = vadd.f32 %v1824_v50, %v1320_v46  ;;  %v2012_v55 = vadd.f32 %v1937_v51, %v1322_v47  ;;  %v1342_v46 = vld [vmem:[#allocation2 + $0x1d8] sm:$0xff]  ;;  %v1341_v51 = vld [vmem:[#allocation2 + $0x90] sm:$0xff] }
 0x25c   : > { %v1826_v56 = vpop.f32.mrf.mxu0  ;;  %v1939_v57 = vpop.f32.mrf.mxu1 }
 0x25d   : > { %2074 = vst [vmem:[#allocation2 + $0x1e8] sm:$0xff] %v2010_v54  ;;  %2076 = vst [vmem:[#allocation2 + $0x160] sm:$0xff] %v2012_v55  ;;  %v2011_v60 = vadd.f32 %v1826_v56, %v1321_v52  ;;  %v2013_v61 = vadd.f32 %v1939_v57, %v1323_v53  ;;  %v1343_v52 = vld [vmem:[#allocation2 + $0xd0] sm:$0xff]  ;;  %v1344_v57 = vld [vmem:[#allocation2 + $0xb8] sm:$0xff] }
 0x25e   : > { %v1828_v62 = vpop.f32.mrf.mxu0  ;;  %v1941_v63 = vpop.f32.mrf.mxu1 }
 0x25f   : > { %2075 = vst [vmem:[#allocation2 + $0xf8] sm:$0xff] %v2011_v60  ;;  %2077 = vst [vmem:[#allocation2 + $0x30] sm:$0xff] %v2013_v61  ;;  %v2014_v2 = vadd.f32 %v1828_v62, %v1324_v58  ;;  %v2016_v3 = vadd.f32 %v1941_v63, %v1326_v59  ;;  %v1346_v58 = vld [vmem:[#allocation2 + $0xa8] sm:$0xff] }
 0x260   : > { %v1830_v4 = vpop.f32.mrf.mxu0  ;;  %v1943_v5 = vpop.f32.mrf.mxu1  ;;  %v1345_v63 = vld [vmem:[#allocation2 + $0x88] sm:$0xff] }
 0x261   : > { %2078 = vst [vmem:[#allocation2 + $0x1e0] sm:$0xff] %v2014_v2  ;;  %2080 = vst [vmem:[#allocation2 + $0xf0] sm:$0xff] %v2016_v3  ;;  %v2015_v8 = vadd.f32 %v1830_v4, %v1325_v0  ;;  %v2017_v9 = vadd.f32 %v1943_v5, %v1327_v1  ;;  %v1347_v0 = vld [vmem:[#allocation2 + $0x1c8] sm:$0xff]  ;;  %v1348_v5 = vld [vmem:[#allocation2 + $0x170] sm:$0xff] }
 0x262   : > { %v1834_v10 = vpop.f32.mrf.mxu0  ;;  %v1947_v11 = vpop.f32.mrf.mxu1 }
 0x263   : > { %2079 = vst [vmem:[#allocation2] sm:$0xff] %v2015_v8  ;;  %2081 = vst [vmem:[#allocation2 + $0x8] sm:$0xff] %v2017_v9  ;;  %v2018_v14 = vadd.f32 %v1834_v10, %v1328_v6  ;;  %v2020_v15 = vadd.f32 %v1947_v11, %v1330_v7  ;;  %v1350_v6 = vld [vmem:[#allocation2 + $0x68] sm:$0xff]  ;;  %v1349_v11 = vld [vmem:[#allocation2 + $0x178] sm:$0xff] }
 0x264   : > { %v1836_v16 = vpop.f32.mrf.mxu0  ;;  %v1949_v17 = vpop.f32.mrf.mxu1 }
 0x265   : > { %2082 = vst [vmem:[#allocation2 + $0x148] sm:$0xff] %v2018_v14  ;;  %2084 = vst [vmem:[#allocation2 + $0x100] sm:$0xff] %v2020_v15  ;;  %v2019_v20 = vadd.f32 %v1836_v16, %v1329_v12  ;;  %v2021_v21 = vadd.f32 %v1949_v17, %v1331_v13  ;;  %v1351_v12 = vld [vmem:[#allocation2 + $0x190] sm:$0xff]  ;;  %v1352_v17 = vld [vmem:[#allocation2 + $0x198] sm:$0xff] }
 0x266   : > { %v1838_v22 = vpop.f32.mrf.mxu0  ;;  %v1951_v23 = vpop.f32.mrf.mxu1 }
 0x267   : > { %2083 = vst [vmem:[#allocation2 + $0x1d0] sm:$0xff] %v2019_v20  ;;  %2085 = vst [vmem:[#allocation2 + $0xc8] sm:$0xff] %v2021_v21  ;;  %v2022_v26 = vadd.f32 %v1838_v22, %v1332_v18  ;;  %v2024_v27 = vadd.f32 %v1951_v23, %v1334_v19  ;;  %v1354_v18 = vld [vmem:[#allocation2 + $0xc0] sm:$0xff]  ;;  %v1353_v23 = vld [vmem:[#allocation2 + $0x38] sm:$0xff] }
 0x268   : > { %v1840_v28 = vpop.f32.mrf.mxu0  ;;  %v1953_v29 = vpop.f32.mrf.mxu1 }
 0x269   : > { %2086 = vst [vmem:[#allocation2 + $0x40] sm:$0xff] %v2022_v26  ;;  %2088 = vst [vmem:[#allocation2 + $0x20] sm:$0xff] %v2024_v27  ;;  %v2023_v32 = vadd.f32 %v1840_v28, %v1333_v24  ;;  %v2025_v33 = vadd.f32 %v1953_v29, %v1335_v25  ;;  %v1355_v24 = vld [vmem:[#allocation2 + $0x1c0] sm:$0xff]  ;;  %v1356_v29 = vld [vmem:[#allocation2 + $0x158] sm:$0xff] }
 0x26a   : > { %v1844_v39 = vpop.f32.mrf.mxu0  ;;  %v1957_v37 = vpop.f32.mrf.mxu1 }
 0x26b   : > { %2087 = vst [vmem:[#allocation2 + $0x1f8] sm:$0xff] %v2023_v32  ;;  %2089 = vst [vmem:[#allocation2 + $0x128] sm:$0xff] %v2025_v33  ;;  %v2026_v41 = vadd.f32 %v1844_v39, %v1336_v30  ;;  %v2028_v42 = vadd.f32 %v1957_v37, %v1338_v31  ;;  %v1358_v30 = vld [vmem:[#allocation2 + $0x58] sm:$0xff]  ;;  %v1357_v37 = vld [vmem:[#allocation2 + $0x10] sm:$0xff] }
 0x26c   : > { %v1846_v43 = vpop.f32.mrf.mxu0  ;;  %v1959_v44 = vpop.f32.mrf.mxu1 }
 0x26d   : > { %2090 = vst [vmem:[#allocation2 + $0x1a0] sm:$0xff] %v2026_v41  ;;  %2092 = vst [vmem:[#allocation2 + $0xe8] sm:$0xff] %v2028_v42  ;;  %v2027_v47 = vadd.f32 %v1846_v43, %v1337_v38  ;;  %v2029_v48 = vadd.f32 %v1959_v44, %v1339_v40  ;;  %v1359_v38 = vld [vmem:[#allocation2 + $0xa0] sm:$0xff] }
 0x26e   : > { %v1848_v49 = vpop.f32.mrf.mxu0  ;;  %v1961_v50 = vpop.f32.mrf.mxu1 }
 0x26f   : > { %2091 = vst [vmem:[#allocation2 + $0x1f0] sm:$0xff] %v2027_v47  ;;  %2093 = vst [vmem:[#allocation2 + $0x78] sm:$0xff] %v2029_v48  ;;  %v2030_v53 = vadd.f32 %v1848_v49, %v1340_v45  ;;  %v2032_v54 = vadd.f32 %v1961_v50, %v1342_v46 }
 0x270   : > { %v1850_v55 = vpop.f32.mrf.mxu0  ;;  %v1963_v56 = vpop.f32.mrf.mxu1 }
 0x271   : > { %2094 = vst [vmem:[#allocation2 + $0x70] sm:$0xff] %v2030_v53  ;;  %2096 = vst [vmem:[#allocation2 + $0x1d8] sm:$0xff] %v2032_v54  ;;  %v2031_v59 = vadd.f32 %v1850_v55, %v1341_v51  ;;  %v2033_v60 = vadd.f32 %v1963_v56, %v1343_v52 }
 0x272   : > { %v1854_v61 = vpop.f32.mrf.mxu0  ;;  %v1967_v62 = vpop.f32.mrf.mxu1 }
 0x273   : > { %2095 = vst [vmem:[#allocation2 + $0x90] sm:$0xff] %v2031_v59  ;;  %2097 = vst [vmem:[#allocation2 + $0xd0] sm:$0xff] %v2033_v60  ;;  %v2034_v1 = vadd.f32 %v1854_v61, %v1344_v57  ;;  %v2036_v2 = vadd.f32 %v1967_v62, %v1346_v58 }
 0x274   : > { %v1856_v3 = vpop.f32.mrf.mxu0  ;;  %v1969_v4 = vpop.f32.mrf.mxu1 }
 0x275   : > { %2098 = vst [vmem:[#allocation2 + $0xb8] sm:$0xff] %v2034_v1  ;;  %2100 = vst [vmem:[#allocation2 + $0xa8] sm:$0xff] %v2036_v2  ;;  %v2035_v7 = vadd.f32 %v1856_v3, %v1345_v63  ;;  %v2037_v8 = vadd.f32 %v1969_v4, %v1347_v0 }
 0x276   : > { %v1858_v9 = vpop.f32.mrf.mxu0  ;;  %v1971_v10 = vpop.f32.mrf.mxu1 }
 0x277   : > { %2099 = vst [vmem:[#allocation2 + $0x88] sm:$0xff] %v2035_v7  ;;  %2101 = vst [vmem:[#allocation2 + $0x1c8] sm:$0xff] %v2037_v8  ;;  %v2038_v13 = vadd.f32 %v1858_v9, %v1348_v5  ;;  %v2040_v14 = vadd.f32 %v1971_v10, %v1350_v6 }
 0x278   : > { %v1860_v15 = vpop.f32.mrf.mxu0  ;;  %v1973_v16 = vpop.f32.mrf.mxu1 }
 0x279   : > { %2102 = vst [vmem:[#allocation2 + $0x170] sm:$0xff] %v2038_v13  ;;  %2104 = vst [vmem:[#allocation2 + $0x68] sm:$0xff] %v2040_v14  ;;  %v2039_v19 = vadd.f32 %v1860_v15, %v1349_v11  ;;  %v2041_v20 = vadd.f32 %v1973_v16, %v1351_v12 }
 0x27a   : > { %v1864_v21 = vpop.f32.mrf.mxu0  ;;  %v1977_v22 = vpop.f32.mrf.mxu1 }
 0x27b   : > { %2103 = vst [vmem:[#allocation2 + $0x178] sm:$0xff] %v2039_v19  ;;  %2105 = vst [vmem:[#allocation2 + $0x190] sm:$0xff] %v2041_v20  ;;  %v2042_v25 = vadd.f32 %v1864_v21, %v1352_v17  ;;  %v2044_v26 = vadd.f32 %v1977_v22, %v1354_v18 }
 0x27c   : > { %v1866_v27 = vpop.f32.mrf.mxu0  ;;  %v1979_v28 = vpop.f32.mrf.mxu1 }
 0x27d   : > { %2106 = vst [vmem:[#allocation2 + $0x198] sm:$0xff] %v2042_v25  ;;  %2108 = vst [vmem:[#allocation2 + $0xc0] sm:$0xff] %v2044_v26  ;;  %v2043_v31 = vadd.f32 %v1866_v27, %v1353_v23  ;;  %v2045_v32 = vadd.f32 %v1979_v28, %v1355_v24 }
 0x27e   : > { %v1868_v33 = vpop.f32.mrf.mxu0  ;;  %v1981_v39 = vpop.f32.mrf.mxu1 }
 0x27f   : > { %2107 = vst [vmem:[#allocation2 + $0x38] sm:$0xff] %v2043_v31  ;;  %2109 = vst [vmem:[#allocation2 + $0x1c0] sm:$0xff] %v2045_v32  ;;  %v2046_v40 = vadd.f32 %v1868_v33, %v1356_v29  ;;  %v2048_v41 = vadd.f32 %v1981_v39, %v1358_v30  ;;  %2117 = sbr.rel (%p2802_p2) target bundleno = 807 (0x327), region = 64 }
 0x280   : > { %v1870_v42 = vpop.f32.mrf.mxu0  ;;  %v1983_v43 = vpop.f32.mrf.mxu1 }
 0x281   : > { %2110 = vst [vmem:[#allocation2 + $0x158] sm:$0xff] %v2046_v40  ;;  %2112 = vst [vmem:[#allocation2 + $0x58] sm:$0xff] %v2048_v41  ;;  %v2047_v44 = vadd.f32 %v1870_v42, %v1357_v37  ;;  %v2049_v45 = vadd.f32 %v1983_v43, %v1359_v38 }
 0x283   : > { %2111 = vst [vmem:[#allocation2 + $0x10] sm:$0xff] %v2047_v44  ;;  %2113 = vst [vmem:[#allocation2 + $0xa0] sm:$0xff] %v2049_v45 }
 0x284   : > { %v2270_v46 = vld [vmem:[%s3901_s1 + $0x10] sm:$0xff]  ;;  %v2268_v47 = vld [vmem:[%s3901_s1] sm:$0xff]  ;;  %v3312_v48 = vmov 0   ;;  %v2271_v49 = vld [vmem:[%s3901_s1 + $0x18] sm:$0xff]  ;;  %v2194_v63 = vsub.s32 2, %v3691_v34  ;;  %v2198_v0 = vsub.s32 3, %v3691_v34 }
 0x285   : > { %3137 = vset.pattern.permute.xlu1 %v3312_v48  ;;  %3136 = vset.pattern.permute.xlu0 %v3312_v48  ;;  %v2269_v50 = vld [vmem:[%s3901_s1 + $0x8] sm:$0xff]  ;;  %v2272_v52 = vld [vmem:[%s3901_s1 + $0x20] sm:$0xff]  ;;  %v2275_v53 = vld [vmem:[%s3901_s1 + $0x38] sm:$0xff] }
 0x286   : > { %2296 = vperm.xlu1 %3137, %v2270_v46   ;;  %2286 = vperm.xlu0 %3136, %v2268_v47   ;;  %v2273_v51 = vld [vmem:[%s3901_s1 + $0x28] sm:$0xff]  ;;  %v2274_v54 = vld [vmem:[%s3901_s1 + $0x30] sm:$0xff]  ;;  %v2276_v56 = vld [vmem:[%s3901_s1 + $0x40] sm:$0xff] }
 0x287   : > { %v2277_v55 = vld [vmem:[%s3901_s1 + $0x48] sm:$0xff]  ;;  %v2279_v57 = vld [vmem:[%s3901_s1 + $0x58] sm:$0xff]  ;;  %v2278_v58 = vld [vmem:[%s3901_s1 + $0x50] sm:$0xff] }
 0x288   : > { %v2281_v59 = vld [vmem:[%s3901_s1 + $0x68] sm:$0xff]  ;;  %v2280_v60 = vld [vmem:[%s3901_s1 + $0x60] sm:$0xff]  ;;  %v2283_v61 = vld [vmem:[%s3901_s1 + $0x78] sm:$0xff] }
 0x289   : > { %v2282_v62 = vld [vmem:[%s3901_s1 + $0x70] sm:$0xff]  ;;  %v2182_v1 = vld [vmem:[%s3905_s5] sm:$0xf]  ;;  %v2128_v4 = vld [vmem:[#allocation2 + $0x118] sm:$0xff] }
 0x28a   : > { %2301 = vperm.xlu1 %3137, %v2271_v49   ;;  %2291 = vperm.xlu0 %3136, %v2269_v50   ;;  %v2126_v2 = vld [vmem:[#allocation2 + $0x180] sm:$0xff]  ;;  %v2127_v3 = vld [vmem:[#allocation2 + $0x110] sm:$0xff]  ;;  %v2129_v5 = vld [vmem:[#allocation2 + $0x98] sm:$0xff]  ;;  %v3796_v6 = vrot.slane %v2182_v1, %v550_v36  ;;  %v3800_v7 = vrot.slane %v2182_v1, %v554_v35  ;;  %v3802_v8 = vrot.slane %v2182_v1, %v2194_v63 }
 0x28b   : > { %v3804_v9 = vrot.slane %v2182_v1, %v2198_v0  ;;  %v2118_v10 = vld [vmem:[#allocation2 + $0xb0] sm:$0xff]  ;;  %v2120_v12 = vld [vmem:[#allocation2 + $0xd8] sm:$0xff]  ;;  %v2130_v14 = vld [vmem:[#allocation2 + $0x120] sm:$0xff] }
 0x28c   : > { %v2119_v11 = vld [vmem:[#allocation2 + $0x1b0] sm:$0xff]  ;;  %v2121_v13 = vld [vmem:[#allocation2 + $0x18] sm:$0xff]  ;;  %v2132_v16 = vld [vmem:[#allocation2 + $0x108] sm:$0xff]  ;;  %v2212_v36 = vadd.f32 %v3796_v6, %v2126_v2  ;;  %v2213_v19 = vadd.f32 %v3800_v7, %v2127_v3  ;;  %v2214_v34 = vadd.f32 %v3802_v8, %v2128_v4  ;;  %v2204_v23 = vadd.f32 %v3796_v6, %v2118_v10 }
 0x28d   : > { %v2131_v15 = vld [vmem:[#allocation2 + $0x150] sm:$0xff]  ;;  %v2133_v17 = vld [vmem:[#allocation2 + $0x60] sm:$0xff]  ;;  %v2215_v35 = vadd.f32 %v3804_v9, %v2129_v5  ;;  %v2123_v20 = vld [vmem:[#allocation2 + $0x168] sm:$0xff]  ;;  %v2205_v24 = vadd.f32 %v3800_v7, %v2119_v11  ;;  %v2206_v25 = vadd.f32 %v3802_v8, %v2120_v12  ;;  %v2207_v26 = vadd.f32 %v3804_v9, %v2121_v13 }
 0x28e   : > { %2311 = vperm.xlu1 %3137, %v2273_v51   ;;  %2306 = vperm.xlu0 %3136, %v2272_v52   ;;  %v2122_v18 = vld [vmem:[#allocation2 + $0x50] sm:$0xff]  ;;  %v2125_v22 = vld [vmem:[#allocation2 + $0x48] sm:$0xff]  ;;  %v2216_v27 = vadd.f32 %v3796_v6, %v2130_v14  ;;  %v2217_v28 = vadd.f32 %v3800_v7, %v2131_v15  ;;  %v2218_v29 = vadd.f32 %v3802_v8, %v2132_v16  ;;  %v2138_v31 = vld [vmem:[#allocation2 + $0x80] sm:$0xff] }
 0x28f   : > { %v2124_v21 = vld [vmem:[#allocation2 + $0x130] sm:$0xff]  ;;  %v2219_v30 = vadd.f32 %v3804_v9, %v2133_v17  ;;  %v2139_v32 = vld [vmem:[#allocation2 + $0x1a8] sm:$0xff]  ;;  %v2208_v37 = vadd.f32 %v3796_v6, %v2122_v18  ;;  %v2209_v38 = vadd.f32 %v3800_v7, %v2123_v20  ;;  %v2211_v41 = vadd.f32 %v3804_v9, %v2125_v22  ;;  %v2140_v42 = vld [vmem:[#allocation2 + $0x1b8] sm:$0xff] }
 0x290   : > { %v2210_v40 = vadd.f32 %v3802_v8, %v2124_v21  ;;  %v2141_v43 = vld [vmem:[#allocation2 + $0x28] sm:$0xff]  ;;  %v2134_v44 = vld [vmem:[#allocation2 + $0xe0] sm:$0xff]  ;;  %v2136_v50 = vld [vmem:[#allocation2 + $0x138] sm:$0xff] }
 0x291   : > { %v2135_v49 = vld [vmem:[#allocation2 + $0x188] sm:$0xff]  ;;  %v2137_v51 = vld [vmem:[#allocation2 + $0x140] sm:$0xff]  ;;  %v2220_v0 = vadd.f32 %v3796_v6, %v2134_v44  ;;  %v2222_v2 = vadd.f32 %v3802_v8, %v2136_v50  ;;  %v2148_v4 = vld [vmem:[#allocation2 + $0xf0] sm:$0xff] }
 0x292   : > { %2321 = vperm.xlu1 %3137, %v2275_v53   ;;  %2316 = vperm.xlu0 %3136, %v2274_v54   ;;  %v2221_v1 = vadd.f32 %v3800_v7, %v2135_v49  ;;  %v2223_v3 = vadd.f32 %v3804_v9, %v2137_v51  ;;  %v2149_v5 = vld [vmem:[#allocation2 + $0x8] sm:$0xff]  ;;  %v2143_v15 = vld [vmem:[#allocation2 + $0xf8] sm:$0xff]  ;;  %v2144_v16 = vld [vmem:[#allocation2 + $0x160] sm:$0xff]  ;;  %v2234_v21 = vadd.f32 %v3802_v8, %v2148_v4 }
 0x293   : > { %v2142_v10 = vld [vmem:[#allocation2 + $0x1e8] sm:$0xff]  ;;  %v2145_v17 = vld [vmem:[#allocation2 + $0x30] sm:$0xff]  ;;  %v2235_v22 = vadd.f32 %v3804_v9, %v2149_v5  ;;  %v2161_v5 = vld [vmem:[#allocation2 + $0x78] sm:$0xff] }
 0x294   : > { %v2160_v4 = vld [vmem:[#allocation2 + $0xe8] sm:$0xff] }
 0x296   : > { %2331 = vperm.xlu1 %3137, %v2277_v55   ;;  %2326 = vperm.xlu0 %3136, %v2276_v56   ;;  %v2224_v56 = vadd.f32 %v3796_v6, %v2138_v31  ;;  %v2156_v31 = vld [vmem:[#allocation2 + $0x20] sm:$0xff] }
 0x297   : > { %v2242_v50 = vadd.f32 %v3802_v8, %v2156_v31  ;;  %v2168_v31 = vld [vmem:[#allocation2 + $0xa8] sm:$0xff] }
 0x29a   : > { %2341 = vperm.xlu1 %3137, %v2279_v57   ;;  %2336 = vperm.xlu0 %3136, %v2278_v58   ;;  %v2225_v57 = vadd.f32 %v3800_v7, %v2139_v32  ;;  %v2226_v58 = vadd.f32 %v3802_v8, %v2140_v42  ;;  %v2157_v32 = vld [vmem:[#allocation2 + $0x128] sm:$0xff]  ;;  %v2152_v42 = vld [vmem:[#allocation2 + $0x100] sm:$0xff] }
 0x29b   : > { %v2243_v51 = vadd.f32 %v3804_v9, %v2157_v32  ;;  %v2169_v32 = vld [vmem:[#allocation2 + $0x1c8] sm:$0xff] }
 0x29e   : > { %2351 = vperm.xlu1 %3137, %v2281_v59   ;;  %2346 = vperm.xlu0 %3136, %v2280_v60   ;;  %v2227_v59 = vadd.f32 %v3804_v9, %v2141_v43  ;;  %v2146_v60 = vld [vmem:[#allocation2 + $0x1e0] sm:$0xff]  ;;  %v2153_v43 = vld [vmem:[#allocation2 + $0xc8] sm:$0xff] }
 0x2a2   : > { %2361 = vperm.xlu1 %3137, %v2283_v61   ;;  %2356 = vperm.xlu0 %3136, %v2282_v62   ;;  %v2147_v61 = vld [vmem:[#allocation2] sm:$0xff] }
 0x2a3   : > { %v2233_v20 = vadd.f32 %v3800_v7, %v2147_v61  ;;  %v2165_v61 = vld [vmem:[#allocation2 + $0xd0] sm:$0xff] }
 0x301   : > { %v2297_v33 = vpop.permute.xlu1 %2296  ;;  %v2287_v39 = vpop.permute.xlu0 %2286 }
 0x302   : > { %v2372_v45 = vmul.f32 %v2297_v33, %v2212_v36  ;;  %v2373_v46 = vmul.f32 %v2297_v33, %v2213_v19  ;;  %v2374_v47 = vmul.f32 %v2297_v33, %v2214_v34  ;;  %v2375_v48 = vmul.f32 %v2297_v33, %v2215_v35  ;;  %v2150_v33 = vld [vmem:[#allocation2 + $0x148] sm:$0xff] }
 0x303   : > { %v2364_v52 = vmul.f32 %v2287_v39, %v2204_v23  ;;  %v2365_v53 = vmul.f32 %v2287_v39, %v2205_v24  ;;  %v2366_v54 = vmul.f32 %v2287_v39, %v2206_v25  ;;  %v2367_v55 = vmul.f32 %v2287_v39, %v2207_v26  ;;  %v2154_v23 = vld [vmem:[#allocation2 + $0x40] sm:$0xff]  ;;  %v2155_v24 = vld [vmem:[#allocation2 + $0x1f8] sm:$0xff] }
 0x304   : > { %2436 = vst [vmem:[#allocation9 + $0x40] sm:$0xff] %v2372_v45  ;;  %2437 = vst [vmem:[#allocation9 + $0x48] sm:$0xff] %v2373_v46  ;;  %v2232_v35 = vadd.f32 %v3796_v6, %v2146_v60  ;;  %v2241_v49 = vadd.f32 %v3800_v7, %v2155_v24  ;;  %v2164_v60 = vld [vmem:[#allocation2 + $0x1d8] sm:$0xff]  ;;  %v2173_v24 = vld [vmem:[#allocation2 + $0x190] sm:$0xff] }
 0x305   : > { %2438 = vst [vmem:[#allocation9 + $0x50] sm:$0xff] %v2374_v47  ;;  %2439 = vst [vmem:[#allocation9 + $0x58] sm:$0xff] %v2375_v48  ;;  %v2302_v62 = vpop.permute.xlu1 %2301  ;;  %v2292_v63 = vpop.permute.xlu0 %2291  ;;  %v2240_v48 = vadd.f32 %v3796_v6, %v2154_v23  ;;  %v2172_v23 = vld [vmem:[#allocation2 + $0x68] sm:$0xff] }
 0x306   : > { %2428 = vst [vmem:[#allocation9] sm:$0xff] %v2364_v52  ;;  %2429 = vst [vmem:[#allocation9 + $0x8] sm:$0xff] %v2365_v53  ;;  %v2376_v11 = vmul.f32 %v2302_v62, %v2216_v27  ;;  %v2377_v12 = vmul.f32 %v2302_v62, %v2217_v28  ;;  %v2378_v13 = vmul.f32 %v2302_v62, %v2218_v29  ;;  %v2162_v52 = vld [vmem:[#allocation2 + $0x70] sm:$0xff] }
 0x307   : > { %2430 = vst [vmem:[#allocation9 + $0x10] sm:$0xff] %v2366_v54  ;;  %2431 = vst [vmem:[#allocation9 + $0x18] sm:$0xff] %v2367_v55  ;;  %v2379_v14 = vmul.f32 %v2302_v62, %v2219_v30  ;;  %v2368_v18 = vmul.f32 %v2292_v63, %v2208_v37  ;;  %v2369_v36 = vmul.f32 %v2292_v63, %v2209_v38  ;;  %v2163_v53 = vld [vmem:[#allocation2 + $0x90] sm:$0xff]  ;;  %v2158_v62 = vld [vmem:[#allocation2 + $0x1a0] sm:$0xff] }
 0x308   : > { %v2370_v19 = vmul.f32 %v2292_v63, %v2210_v40  ;;  %v2371_v34 = vmul.f32 %v2292_v63, %v2211_v41  ;;  %2440 = vst [vmem:[#allocation9 + $0x60] sm:$0xff] %v2376_v11  ;;  %2441 = vst [vmem:[#allocation9 + $0x68] sm:$0xff] %v2377_v12  ;;  %v2228_v27 = vadd.f32 %v3796_v6, %v2142_v10  ;;  %v2151_v41 = vld [vmem:[#allocation2 + $0x1d0] sm:$0xff] }
 0x309   : > { %2442 = vst [vmem:[#allocation9 + $0x70] sm:$0xff] %v2378_v13  ;;  %2443 = vst [vmem:[#allocation9 + $0x78] sm:$0xff] %v2379_v14  ;;  %v2312_v25 = vpop.permute.xlu1 %2311  ;;  %v2307_v26 = vpop.permute.xlu0 %2306  ;;  %v2229_v28 = vadd.f32 %v3800_v7, %v2143_v15  ;;  %v2230_v29 = vadd.f32 %v3802_v8, %v2144_v16  ;;  %v2231_v30 = vadd.f32 %v3804_v9, %v2145_v17 }
 0x30a   : > { %2432 = vst [vmem:[#allocation9 + $0x20] sm:$0xff] %v2368_v18  ;;  %2433 = vst [vmem:[#allocation9 + $0x28] sm:$0xff] %v2369_v36  ;;  %v2384_v39 = vmul.f32 %v2312_v25, %v2224_v56  ;;  %v2385_v37 = vmul.f32 %v2312_v25, %v2225_v57  ;;  %v2386_v38 = vmul.f32 %v2312_v25, %v2226_v58  ;;  %v2170_v18 = vld [vmem:[#allocation2 + $0x170] sm:$0xff]  ;;  %v2171_v36 = vld [vmem:[#allocation2 + $0x178] sm:$0xff] }
 0x30b   : > { %2434 = vst [vmem:[#allocation9 + $0x30] sm:$0xff] %v2370_v19  ;;  %2435 = vst [vmem:[#allocation9 + $0x38] sm:$0xff] %v2371_v34  ;;  %v2387_v40 = vmul.f32 %v2312_v25, %v2227_v59  ;;  %v2380_v44 = vmul.f32 %v2307_v26, %v2220_v0  ;;  %v2381_v45 = vmul.f32 %v2307_v26, %v2221_v1  ;;  %v2166_v25 = vld [vmem:[#allocation2 + $0xb8] sm:$0xff] }
 0x30c   : > { %v2382_v46 = vmul.f32 %v2307_v26, %v2222_v2  ;;  %v2383_v47 = vmul.f32 %v2307_v26, %v2223_v3  ;;  %2448 = vst [vmem:[#allocation9 + $0xa0] sm:$0xff] %v2384_v39  ;;  %2449 = vst [vmem:[#allocation9 + $0xa8] sm:$0xff] %v2385_v37  ;;  %v2236_v56 = vadd.f32 %v3796_v6, %v2150_v33  ;;  %v2159_v3 = vld [vmem:[#allocation2 + $0x1f0] sm:$0xff] }
 0x30d   : > { %2450 = vst [vmem:[#allocation9 + $0xb0] sm:$0xff] %v2386_v38  ;;  %2451 = vst [vmem:[#allocation9 + $0xb8] sm:$0xff] %v2387_v40  ;;  %v2322_v54 = vpop.permute.xlu1 %2321  ;;  %v2317_v55 = vpop.permute.xlu0 %2316  ;;  %v2237_v57 = vadd.f32 %v3800_v7, %v2151_v41  ;;  %v2238_v58 = vadd.f32 %v3802_v8, %v2152_v42  ;;  %v2239_v59 = vadd.f32 %v3804_v9, %v2153_v43 }
 0x30e   : > { %2444 = vst [vmem:[#allocation9 + $0x80] sm:$0xff] %v2380_v44  ;;  %2445 = vst [vmem:[#allocation9 + $0x88] sm:$0xff] %v2381_v45  ;;  %v2392_v63 = vmul.f32 %v2322_v54, %v2232_v35  ;;  %v2393_v0 = vmul.f32 %v2322_v54, %v2233_v20  ;;  %v2394_v1 = vmul.f32 %v2322_v54, %v2234_v21  ;;  %v2178_v44 = vld [vmem:[#allocation2 + $0x158] sm:$0xff]  ;;  %v2179_v45 = vld [vmem:[#allocation2 + $0x10] sm:$0xff] }
 0x30f   : > { %2446 = vst [vmem:[#allocation9 + $0x90] sm:$0xff] %v2382_v46  ;;  %2447 = vst [vmem:[#allocation9 + $0x98] sm:$0xff] %v2383_v47  ;;  %v2395_v2 = vmul.f32 %v2322_v54, %v2235_v22  ;;  %v2388_v10 = vmul.f32 %v2317_v55, %v2228_v27  ;;  %v2389_v11 = vmul.f32 %v2317_v55, %v2229_v28  ;;  %v2174_v54 = vld [vmem:[#allocation2 + $0x198] sm:$0xff] }
 0x310   : > { %v2390_v12 = vmul.f32 %v2317_v55, %v2230_v29  ;;  %v2391_v13 = vmul.f32 %v2317_v55, %v2231_v30  ;;  %2456 = vst [vmem:[#allocation9 + $0xe0] sm:$0xff] %v2392_v63  ;;  %2457 = vst [vmem:[#allocation9 + $0xe8] sm:$0xff] %v2393_v0  ;;  %v2248_v14 = vadd.f32 %v3796_v6, %v2162_v52  ;;  %v2167_v30 = vld [vmem:[#allocation2 + $0x88] sm:$0xff]  ;;  %v2180_v52 = vld [vmem:[#allocation2 + $0x58] sm:$0xff] }
 0x311   : > { %2458 = vst [vmem:[#allocation9 + $0xf0] sm:$0xff] %v2394_v1  ;;  %2459 = vst [vmem:[#allocation9 + $0xf8] sm:$0xff] %v2395_v2  ;;  %v2249_v15 = vadd.f32 %v3800_v7, %v2163_v53  ;;  %v2250_v16 = vadd.f32 %v3802_v8, %v2164_v60  ;;  %v2251_v17 = vadd.f32 %v3804_v9, %v2165_v61  ;;  %v2332_v19 = vpop.permute.xlu1 %2331  ;;  %v2327_v34 = vpop.permute.xlu0 %2326  ;;  %v2181_v53 = vld [vmem:[#allocation2 + $0xa0] sm:$0xff] }
 0x312   : > { %2452 = vst [vmem:[#allocation9 + $0xc0] sm:$0xff] %v2388_v10  ;;  %2453 = vst [vmem:[#allocation9 + $0xc8] sm:$0xff] %v2389_v11  ;;  %v2244_v35 = vadd.f32 %v3796_v6, %v2158_v62  ;;  %v2245_v20 = vadd.f32 %v3800_v7, %v2159_v3  ;;  %v2246_v21 = vadd.f32 %v3802_v8, %v2160_v4  ;;  %v2176_v60 = vld [vmem:[#allocation2 + $0xc0] sm:$0xff] }
 0x313   : > { %2454 = vst [vmem:[#allocation9 + $0xd0] sm:$0xff] %v2390_v12  ;;  %2455 = vst [vmem:[#allocation9 + $0xd8] sm:$0xff] %v2391_v13  ;;  %v2247_v22 = vadd.f32 %v3804_v9, %v2161_v5  ;;  %v2400_v26 = vmul.f32 %v2332_v19, %v2240_v48  ;;  %v2401_v27 = vmul.f32 %v2332_v19, %v2241_v49  ;;  %v2177_v61 = vld [vmem:[#allocation2 + $0x1c0] sm:$0xff] }
 0x314   : > { %v2402_v28 = vmul.f32 %v2332_v19, %v2242_v50  ;;  %v2403_v29 = vmul.f32 %v2332_v19, %v2243_v51  ;;  %v2396_v33 = vmul.f32 %v2327_v34, %v2236_v56  ;;  %v2397_v39 = vmul.f32 %v2327_v34, %v2237_v57 }
 0x315   : > { %v2398_v37 = vmul.f32 %v2327_v34, %v2238_v58  ;;  %v2399_v38 = vmul.f32 %v2327_v34, %v2239_v59  ;;  %2464 = vst [vmem:[#allocation9 + $0x120] sm:$0xff] %v2400_v26  ;;  %2465 = vst [vmem:[#allocation9 + $0x128] sm:$0xff] %v2401_v27  ;;  %v2256_v40 = vadd.f32 %v3796_v6, %v2170_v18  ;;  %v2342_v46 = vpop.permute.xlu1 %2341  ;;  %v2337_v47 = vpop.permute.xlu0 %2336  ;;  %v2175_v59 = vld [vmem:[#allocation2 + $0x38] sm:$0xff] }
 0x316   : > { %2466 = vst [vmem:[#allocation9 + $0x130] sm:$0xff] %v2402_v28  ;;  %2467 = vst [vmem:[#allocation9 + $0x138] sm:$0xff] %v2403_v29  ;;  %v2257_v41 = vadd.f32 %v3800_v7, %v2171_v36  ;;  %v2258_v42 = vadd.f32 %v3802_v8, %v2172_v23  ;;  %v2259_v43 = vadd.f32 %v3804_v9, %v2173_v24 }
 0x317   : > { %2460 = vst [vmem:[#allocation9 + $0x100] sm:$0xff] %v2396_v33  ;;  %2461 = vst [vmem:[#allocation9 + $0x108] sm:$0xff] %v2397_v39  ;;  %v2252_v48 = vadd.f32 %v3796_v6, %v2166_v25  ;;  %v2253_v49 = vadd.f32 %v3800_v7, %v2167_v30  ;;  %v2254_v50 = vadd.f32 %v3802_v8, %v2168_v31 }
 0x318   : > { %2462 = vst [vmem:[#allocation9 + $0x110] sm:$0xff] %v2398_v37  ;;  %2463 = vst [vmem:[#allocation9 + $0x118] sm:$0xff] %v2399_v38  ;;  %v2255_v51 = vadd.f32 %v3804_v9, %v2169_v32  ;;  %v2408_v55 = vmul.f32 %v2342_v46, %v2248_v14  ;;  %v2409_v56 = vmul.f32 %v2342_v46, %v2249_v15 }
 0x319   : > { %v2410_v57 = vmul.f32 %v2342_v46, %v2250_v16  ;;  %v2411_v58 = vmul.f32 %v2342_v46, %v2251_v17  ;;  %v2404_v62 = vmul.f32 %v2337_v47, %v2244_v35  ;;  %v2405_v63 = vmul.f32 %v2337_v47, %v2245_v20  ;;  %v2352_v10 = vpop.permute.xlu1 %2351  ;;  %v2347_v11 = vpop.permute.xlu0 %2346 }
 0x31a   : > { %v2406_v0 = vmul.f32 %v2337_v47, %v2246_v21  ;;  %v2407_v1 = vmul.f32 %v2337_v47, %v2247_v22  ;;  %2472 = vst [vmem:[#allocation9 + $0x160] sm:$0xff] %v2408_v55  ;;  %2473 = vst [vmem:[#allocation9 + $0x168] sm:$0xff] %v2409_v56  ;;  %v2264_v2 = vadd.f32 %v3796_v6, %v2178_v44 }
 0x31b   : > { %2474 = vst [vmem:[#allocation9 + $0x170] sm:$0xff] %v2410_v57  ;;  %2475 = vst [vmem:[#allocation9 + $0x178] sm:$0xff] %v2411_v58  ;;  %v2265_v3 = vadd.f32 %v3800_v7, %v2179_v45  ;;  %v2266_v4 = vadd.f32 %v3802_v8, %v2180_v52  ;;  %v2267_v5 = vadd.f32 %v3804_v9, %v2181_v53 }
 0x31c   : > { %2468 = vst [vmem:[#allocation9 + $0x140] sm:$0xff] %v2404_v62  ;;  %2469 = vst [vmem:[#allocation9 + $0x148] sm:$0xff] %v2405_v63  ;;  %v2260_v12 = vadd.f32 %v3796_v6, %v2174_v54  ;;  %v2261_v13 = vadd.f32 %v3800_v7, %v2175_v59  ;;  %v2262_v14 = vadd.f32 %v3802_v8, %v2176_v60 }
 0x31d   : > { %2470 = vst [vmem:[#allocation9 + $0x150] sm:$0xff] %v2406_v0  ;;  %2471 = vst [vmem:[#allocation9 + $0x158] sm:$0xff] %v2407_v1  ;;  %v2263_v15 = vadd.f32 %v3804_v9, %v2177_v61  ;;  %v2416_v16 = vmul.f32 %v2352_v10, %v2256_v40  ;;  %v2417_v17 = vmul.f32 %v2352_v10, %v2257_v41  ;;  %v2362_v6 = vpop.permute.xlu1 %2361  ;;  %v2357_v7 = vpop.permute.xlu0 %2356 }
 0x31e   : > { %v2418_v18 = vmul.f32 %v2352_v10, %v2258_v42  ;;  %v2419_v36 = vmul.f32 %v2352_v10, %v2259_v43  ;;  %v2412_v19 = vmul.f32 %v2347_v11, %v2252_v48  ;;  %v2413_v34 = vmul.f32 %v2347_v11, %v2253_v49 }
 0x31f   : > { %v2414_v35 = vmul.f32 %v2347_v11, %v2254_v50  ;;  %v2415_v20 = vmul.f32 %v2347_v11, %v2255_v51  ;;  %2480 = vst [vmem:[#allocation9 + $0x1a0] sm:$0xff] %v2416_v16  ;;  %2481 = vst [vmem:[#allocation9 + $0x1a8] sm:$0xff] %v2417_v17  ;;  %v2424_v8 = vmul.f32 %v2362_v6, %v2264_v2 }
 0x320   : > { %2482 = vst [vmem:[#allocation9 + $0x1b0] sm:$0xff] %v2418_v18  ;;  %2483 = vst [vmem:[#allocation9 + $0x1b8] sm:$0xff] %v2419_v36  ;;  %v2425_v9 = vmul.f32 %v2362_v6, %v2265_v3  ;;  %v2426_v21 = vmul.f32 %v2362_v6, %v2266_v4  ;;  %v2427_v22 = vmul.f32 %v2362_v6, %v2267_v5 }
 0x321   : > { %2476 = vst [vmem:[#allocation9 + $0x180] sm:$0xff] %v2412_v19  ;;  %2477 = vst [vmem:[#allocation9 + $0x188] sm:$0xff] %v2413_v34  ;;  %v2420_v23 = vmul.f32 %v2357_v7, %v2260_v12  ;;  %v2421_v24 = vmul.f32 %v2357_v7, %v2261_v13  ;;  %v2422_v25 = vmul.f32 %v2357_v7, %v2262_v14 }
 0x322   : > { %2478 = vst [vmem:[#allocation9 + $0x190] sm:$0xff] %v2414_v35  ;;  %2479 = vst [vmem:[#allocation9 + $0x198] sm:$0xff] %v2415_v20  ;;  %v2423_v26 = vmul.f32 %v2357_v7, %v2263_v15 }
 0x323   : > { %2488 = vst [vmem:[#allocation9 + $0x1e0] sm:$0xff] %v2424_v8  ;;  %2489 = vst [vmem:[#allocation9 + $0x1e8] sm:$0xff] %v2425_v9 }
 0x324   : > { %2490 = vst [vmem:[#allocation9 + $0x1f0] sm:$0xff] %v2426_v21  ;;  %2491 = vst [vmem:[#allocation9 + $0x1f8] sm:$0xff] %v2427_v22 }
 0x325   : > { %2484 = vst [vmem:[#allocation9 + $0x1c0] sm:$0xff] %v2420_v23  ;;  %2485 = vst [vmem:[#allocation9 + $0x1c8] sm:$0xff] %v2421_v24 }
 0x326   : > { %2486 = vst [vmem:[#allocation9 + $0x1d0] sm:$0xff] %v2422_v25  ;;  %2487 = vst [vmem:[#allocation9 + $0x1d8] sm:$0xff] %v2423_v26 }
 0x327 PF: > { %p2836_p5 = scmp.eq.s32.totalorder %s3419_s10, 1  ;;  %s3313_s21 = smov [#allocation9]  }
 0x328   : > { %s2502_s20 = sshll.u32 %s3313_s21, 4  ;;  %s2503_s20 = int_to_ptr.vmem [resolvable:$true] %s2502_s20 }
 0x329   : > { %s3220_s28 = scalar_lea.vmem %s2503_s20, 8192  ;;  %p3227_p11 = scmp.lt.s32.totalorder %s2503_s20, %s2503_s20 }
 0x32a   : > { %p3221_p8 = scmp.ne.s32.totalorder %s2503_s20, %s3220_s28  ;;  %p3228_p12 = scmp.lt.s32.totalorder %s3220_s28, %s3220_s28 }
 0x32c   : > { %p3222_p10 = pnand %p3221_p8, %p2836_p5  ;;  %p3229_p13 = por %p3228_p12, %p3227_p11 }
 0x32e   : > { %p3223_p9 = pneg %p3222_p10 }
 0x330   : > { %p3230_p0 = pnand %p3229_p13, %p3223_p9 }
 0x332   : > { %3233 = shalt.err (!%p3230_p0)
}
 0x333   : > { %s3314_s19 = smov 512   ;;  %s3315_s14 = smov 32  }
 0x334   : > { %2819 = dma.vmem_to_hbm [thread:$0]  (%p2836_p5), %s2503_s20, 8192, %s3906_s6, [#allocation5], %s3314_s19, %s3314_s19, %s3315_s14  }
 0x335   : > { %3277 = dma.done.wait (%p2836_p5), [#allocation5], 8192  }
 0x336   : > { %3279 = vsyncadd (%p2836_p5), [#allocation5], 4294959104 }
 0x337 PF: > { %s21_s26 = sadd.s32 1, %s3302_s26   ;;  %s3911_s21 = smov %s3286_s22 }
 0x338   : > { %p18_p1 = scmp.ge.s32.totalorder %s21_s26, 4   ;;  %s3912_s22 = smov %s3290_s23 }
 0x339   : > { %s3913_s23 = smov %s3394_s8  ;;  %s3914_s24 = smov %s3298_s25 }
 0x33a   : > { %s3915_s25 = smov %s3917_s27  ;;  %20 = sbr.rel (!%p18_p1) target bundleno = 6 (0x6), region = 113 }
 0x33f   :  { %2518 = vsyncpa [#allocation4], 1 }
 0x340   :  { %2520 = vsyncpa [#allocation4 + $0x1], 1 }
 0x341   :  { %2521 = vsyncpa [#allocation7], 1 }
 0x342   :  { %2523 = vsyncpa [#allocation7 + $0x1], 1 }
 0x343   :  { %2524 = vsyncpa [#allocation5], 1 }
 0x344   :  { %2526 = vsyncpa [#allocation5 + $0x1], 1 }

</bundles_post_ra>
